<compile_context>
chip_gen: v7x
topology: tpu7x:2x2x1
jax: 0.10.0
libtpu: 0.0.40
codegen_flags: <defaults>
</compile_context>

<pallas_src>
import functools

import jax
import jax.numpy as jnp
from jax.experimental import pallas as pl
from jax.experimental.pallas import tpu as pltpu


# ----------------------------------------------------------------------------
# Fused kernel: 2-layer LSTM recurrence + FC, single invocation.
# ----------------------------------------------------------------------------
def _fused_lstm_fc_kernel(x_ref, wih1_ref, whh1_ref, b1_ref,
                          wih2_ref, whh2_ref, b2_ref,
                          fcw_ref, fcb_ref,
                          y_ref,
                          gx_scr, h_all_scr,
                          *, seq_len, batch_pad, hidden, out_features):
    S, Bp, H = seq_len, batch_pad, hidden
    G = 4 * H

    # Lane mask selecting the tanh ("g") gate lanes [2H, 3H); PyTorch gate
    # order along the 4H axis is i, f, g, o.  Hoisted out of both time loops.
    lane = jax.lax.broadcasted_iota(jnp.int32, (Bp, G), 1)
    is_g = jnp.logical_and(lane >= 2 * H, lane < 3 * H)

    def run_layer(whh_ref, emit):
        """LSTM recurrence consuming gx_scr (pre-computed x_t @ W_ih^T + bias).

        h/c are register-carried across the fully unrolled time loop (S is
        small & static), so the serial per-step critical path is just
        h @ W_hh^T + gate math.  emit(t, h_t) consumes each new hidden state.
        """
        whh = whh_ref[...]                       # resident across the loop
        h = jnp.zeros((Bp, H), jnp.float32)
        c = jnp.zeros((Bp, H), jnp.float32)
        # TODO(synk): for much larger S switch to lax.fori_loop(unroll=4..8);
        # pltpu.matmul_push_rhs/acc_lhs/pop could additionally pin W_hh in the
        # MXU weight registers across the recurrence.
        for t in range(S):
            r0 = t * Bp                          # static, 8-aligned offset
            gates = gx_scr[r0:r0 + Bp, :] + jnp.dot(
                h.astype(jnp.bfloat16), whh,
                preferred_element_type=jnp.float32)
            # Two full-vreg transcendentals + one lane-mask select instead of
            # four sub-vreg sliced nonlinearities.
            acts = jnp.where(is_g, jnp.tanh(gates), jax.nn.sigmoid(gates))
            i_g = acts[:, 0 * H:1 * H]
            f_g = acts[:, 1 * H:2 * H]
            g_g = acts[:, 2 * H:3 * H]
            o_g = acts[:, 3 * H:4 * H]
            c = f_g * c + i_g * g_g
            h = o_g * jnp.tanh(c)
            emit(t, h)

    def store_h(t, h):
        h_all_scr[t * Bp:(t + 1) * Bp, :] = h    # aligned full-sublane store

    # ---- Layer 1: input projection hoisted out of the recurrence as one
    # (S*Bp, D) x (D, 4H) matmul over all timesteps.
    gx_scr[...] = jnp.dot(x_ref[...], wih1_ref[...],
                          preferred_element_type=jnp.float32) + b1_ref[...]
    run_layer(whh1_ref, store_h)

    # ---- Layer 2: its input projection consumes the layer-1 hidden states,
    # again as one matmul; gx_scr is reused in place.
    gx_scr[...] = jnp.dot(h_all_scr[...].astype(jnp.bfloat16), wih2_ref[...],
                          preferred_element_type=jnp.float32) + b2_ref[...]

    if out_features == 1:
        # out==1 FC fused into the layer-2 loop: VPU multiply + lane reduce
        # per step (off the recurrence dependency chain).  Layer-2 hidden
        # states are never stored; no separate epilogue pass.
        fcw = fcw_ref[...]                       # (1, H)
        fcb = fcb_ref[...]                       # (1, 1)

        def emit_y(t, h):
            y_ref[t * Bp:(t + 1) * Bp, :] = (
                jnp.sum(h * fcw, axis=-1, keepdims=True) + fcb)

        run_layer(whh2_ref, emit_y)
    else:
        run_layer(whh2_ref, store_h)
        # fc_w arrives pre-transposed (H, out) from the wrapper (no in-kernel
        # transpose).
        y_ref[...] = (jnp.dot(h_all_scr[...].astype(jnp.bfloat16),
                              fcw_ref[...],
                              preferred_element_type=jnp.float32)
                      + fcb_ref[...])


# ----------------------------------------------------------------------------
# Wrapper: weight prep, batch padding to sublane size, single pallas_call.
# ----------------------------------------------------------------------------
def lstm_regression_forward(x, params):
    """x: (S, B, input_size) float32 -- PyTorch nn.LSTM default layout."""
    assert len(params["lstm"]) == 2, "fused kernel implements num_layers=2"
    S, B, D_in = x.shape
    (w_ih1, w_hh1, b_ih1, b_hh1), (w_ih2, w_hh2, b_ih2, b_hh2) = params["lstm"]
    H = w_hh1.shape[1]
    out = params["fc_w"].shape[0]
    assert (4 * H) % 128 == 0, "4*hidden must be a multiple of 128 lanes"

    # Pad batch to a full sublane so every per-timestep tile is 8-aligned.
    B_pad = max(8, ((B + 7) // 8) * 8)

    # Pre-transpose weights (kernel computes v @ W_t == v @ W^T), pre-sum the
    # two PyTorch bias vectors.  Matmul operands -> bf16, biases / state f32.
    wih1_t = jnp.transpose(w_ih1).astype(jnp.bfloat16)          # (D_in, 4H)
    whh1_t = jnp.transpose(w_hh1).astype(jnp.bfloat16)          # (H, 4H)
    b1 = (b_ih1 + b_hh1).reshape(1, 4 * H).astype(jnp.float32)
    wih2_t = jnp.transpose(w_ih2).astype(jnp.bfloat16)          # (H, 4H)
    whh2_t = jnp.transpose(w_hh2).astype(jnp.bfloat16)          # (H, 4H)
    b2 = (b_ih2 + b_hh2).reshape(1, 4 * H).astype(jnp.float32)
    if out == 1:
        fc_w = params["fc_w"].reshape(1, H).astype(jnp.float32)   # fused VPU path
    else:
        fc_w = jnp.transpose(params["fc_w"]).astype(jnp.bfloat16)  # (H, out)
    fc_b = params["fc_b"].reshape(1, out).astype(jnp.float32)

    # Pad batch, flatten time into sublanes (row t*B_pad + b == x[t, b]) and
    # cast x to bf16 in the wrapper (halves its DMA bytes).
    x_pad = jnp.zeros((S, B_pad, D_in), x.dtype).at[:, :B, :].set(x)
    x_flat = x_pad.reshape(S * B_pad, D_in).astype(jnp.bfloat16)

    kernel = functools.partial(
        _fused_lstm_fc_kernel, seq_len=S, batch_pad=B_pad, hidden=H,
        out_features=out)

    y_flat = pl.pallas_call(
        kernel,
        out_shape=jax.ShapeDtypeStruct((S * B_pad, out), jnp.float32),
        in_specs=[
            pl.BlockSpec((S * B_pad, D_in), lambda: (0, 0)),   # x (all t)
            pl.BlockSpec((D_in, 4 * H), lambda: (0, 0)),       # W_ih layer 1
            pl.BlockSpec((H, 4 * H), lambda: (0, 0)),          # W_hh layer 1
            pl.BlockSpec((1, 4 * H), lambda: (0, 0)),          # bias layer 1
            pl.BlockSpec((H, 4 * H), lambda: (0, 0)),          # W_ih layer 2
            pl.BlockSpec((H, 4 * H), lambda: (0, 0)),          # W_hh layer 2
            pl.BlockSpec((1, 4 * H), lambda: (0, 0)),          # bias layer 2
            pl.BlockSpec(fc_w.shape, lambda: (0, 0)),          # fc weight
            pl.BlockSpec((1, out), lambda: (0, 0)),            # fc bias
        ],
        out_specs=pl.BlockSpec((S * B_pad, out), lambda: (0, 0)),
        scratch_shapes=[
            pltpu.VMEM((S * B_pad, 4 * H), jnp.float32),   # hoisted input proj.
            pltpu.VMEM((S * B_pad, H), jnp.float32),       # layer-1 hidden states
        ],
    )(x_flat, wih1_t, whh1_t, b1, wih2_t, whh2_t, b2, fc_w, fc_b)

    return y_flat.reshape(S, B_pad, out)[:, :B, :]


# ----------------------------------------------------------------------------
# Params (PyTorch-shaped) + pure-JAX f32 reference for a sanity check.
# ----------------------------------------------------------------------------
def init_params(key, input_size, hidden_size, output_size=1, num_layers=2):
    """uniform(-1/sqrt(H), 1/sqrt(H)), PyTorch weight shapes."""
    k = 1.0 / jnp.sqrt(jnp.float32(hidden_size))
    lstm_params = []
    d_in = input_size
    for _ in range(num_layers):
        key, k1, k2, k3, k4 = jax.random.split(key, 5)
        w_ih = jax.random.uniform(k1, (4 * hidden_size, d_in), jnp.float32, -k, k)
        w_hh = jax.random.uniform(k2, (4 * hidden_size, hidden_size), jnp.float32, -k, k)
        b_ih = jax.random.uniform(k3, (4 * hidden_size,), jnp.float32, -k, k)
        b_hh = jax.random.uniform(k4, (4 * hidden_size,), jnp.float32, -k, k)
        lstm_params.append((w_ih, w_hh, b_ih, b_hh))
        d_in = hidden_size
    key, k5, k6 = jax.random.split(key, 3)
    fc_w = jax.random.uniform(k5, (output_size, hidden_size), jnp.float32, -k, k)
    fc_b = jax.random.uniform(k6, (output_size,), jnp.float32, -k, k)
    return {"lstm": lstm_params, "fc_w": fc_w, "fc_b": fc_b}


def _reference_forward(x, params):
    S, B, _ = x.shape
    layer_in = x
    for (w_ih, w_hh, b_ih, b_hh) in params["lstm"]:
        H = w_hh.shape[1]
        h = jnp.zeros((B, H), jnp.float32)
        c = jnp.zeros((B, H), jnp.float32)
        outs = []
        for t in range(S):
            g = layer_in[t] @ w_ih.T + h @ w_hh.T + b_ih + b_hh
            i = jax.nn.sigmoid(g[:, 0 * H:1 * H])
            f = jax.nn.sigmoid(g[:, 1 * H:2 * H])
            gg = jnp.tanh(g[:, 2 * H:3 * H])
            o = jax.nn.sigmoid(g[:, 3 * H:4 * H])
            c = f * c + i * gg
            h = o * jnp.tanh(c)
            outs.append(h)
        layer_in = jnp.stack(outs, axis=0)
    flat = layer_in.reshape(S * B, -1)
    y = flat @ params["fc_w"].T + params["fc_b"]
    return y.reshape(S, B, -1)


if __name__ == "__main__":
    SEQ, BATCH, INPUT, HIDDEN, OUT = 8, 2, 16, 32, 1

    key = jax.random.PRNGKey(0)
    key, xkey = jax.random.split(key)
    x = jax.random.normal(xkey, (SEQ, BATCH, INPUT), jnp.float32)

    params = init_params(key, INPUT, HIDDEN, OUT, num_layers=2)

    y = lstm_regression_forward(x, params)
    y = jax.block_until_ready(y)

    assert y.shape == (SEQ, BATCH, OUT), y.shape
    assert bool(jnp.all(jnp.isfinite(y)))

    # Loose-tolerance check vs pure-JAX f32 reference (kernel matmul operands
    # are bf16 with f32 accumulation).
    y_ref = _reference_forward(x, params)
    err = float(jnp.max(jnp.abs(y - y_ref)))
    assert err < 0.1, f"max abs err vs reference: {err}"

    print("KERNEL_OK")
</pallas_src>

<mosaic_0001>
module attributes {stable_mosaic.version = 11 : i64} {
  func.func @_fused_lstm_fc_kernel(%arg0: memref<64x16xbf16, #tpu.memory_space<vmem>>, %arg1: memref<16x128xbf16, #tpu.memory_space<vmem>>, %arg2: memref<32x128xbf16, #tpu.memory_space<vmem>>, %arg3: memref<1x128xf32, #tpu.memory_space<vmem>>, %arg4: memref<32x128xbf16, #tpu.memory_space<vmem>>, %arg5: memref<32x128xbf16, #tpu.memory_space<vmem>>, %arg6: memref<1x128xf32, #tpu.memory_space<vmem>>, %arg7: memref<1x32xf32, #tpu.memory_space<vmem>>, %arg8: memref<1x1xf32, #tpu.memory_space<vmem>>, %arg9: memref<64x1xf32, #tpu.memory_space<vmem>>, %arg10: memref<64x128xf32, #tpu.memory_space<vmem>>, %arg11: memref<64x32xf32, #tpu.memory_space<vmem>>) attributes {dimension_semantics = [], scalar_prefetch = 0 : i64, scratch_operands = 2 : i64, tpu.core_type = #tpu.core_type<tc>} {
    %0 = tpu.iota {dimensions = array<i32: 1>} : vector<8x128xi32>
    %c64_i32 = arith.constant 64 : i32
    %1 = vector.broadcast %c64_i32 : i32 to vector<8x128xi32>
    %2 = arith.cmpi sge, %0, %1 : vector<8x128xi32>
    %c96_i32 = arith.constant 96 : i32
    %3 = vector.broadcast %c96_i32 : i32 to vector<8x128xi32>
    %4 = arith.cmpi slt, %0, %3 : vector<8x128xi32>
    %5 = arith.andi %2, %4 : vector<8x128xi1>
    %c0 = arith.constant 0 : index
    %c0_0 = arith.constant 0 : index
    %6 = vector.load %arg0[%c0, %c0_0] : memref<64x16xbf16, #tpu.memory_space<vmem>>, vector<64x16xbf16>
    %c0_1 = arith.constant 0 : index
    %c0_2 = arith.constant 0 : index
    %7 = vector.load %arg1[%c0_1, %c0_2] : memref<16x128xbf16, #tpu.memory_space<vmem>>, vector<16x128xbf16>
    %cst = arith.constant dense<0.000000e+00> : vector<64x128xf32>
    %8 = tpu.matmul %6, %7, %cst {dimension_numbers = #tpu.dot_dimension_numbers<[1], [0], [0], [1], [0, 0, 1, 1], [], []>} : vector<64x16xbf16>, vector<16x128xbf16>, vector<64x128xf32> -> vector<64x128xf32>
    %c0_3 = arith.constant 0 : index
    %c0_4 = arith.constant 0 : index
    %9 = vector.load %arg3[%c0_3, %c0_4] : memref<1x128xf32, #tpu.memory_space<vmem>>, vector<1x128xf32>
    %10 = vector.broadcast %9 : vector<1x128xf32> to vector<64x128xf32>
    %11 = arith.addf %8, %10 : vector<64x128xf32>
    %c0_5 = arith.constant 0 : index
    %c0_6 = arith.constant 0 : index
    %12 = vector.load %arg10[%c0_5, %c0_6] : memref<64x128xf32, #tpu.memory_space<vmem>>, vector<64x128xf32>
    tpu.vector_store %arg10[%c0_5, %c0_6], %11 {strides = array<i32>} : memref<64x128xf32, #tpu.memory_space<vmem>>, vector<64x128xf32>,
    %c0_7 = arith.constant 0 : index
    %c0_8 = arith.constant 0 : index
    %13 = vector.load %arg2[%c0_7, %c0_8] : memref<32x128xbf16, #tpu.memory_space<vmem>>, vector<32x128xbf16>
    %cst_9 = arith.constant 0.000000e+00 : f32
    %14 = vector.broadcast %cst_9 : f32 to vector<8x32xf32>
    %cst_10 = arith.constant 0.000000e+00 : f32
    %15 = vector.broadcast %cst_10 : f32 to vector<8x32xf32>
    %c0_11 = arith.constant 0 : index
    %c0_12 = arith.constant 0 : index
    %16 = vector.load %arg10[%c0_11, %c0_12] : memref<64x128xf32, #tpu.memory_space<vmem>>, vector<8x128xf32>
    %17 = arith.truncf %14 : vector<8x32xf32> to vector<8x32xbf16>
    %cst_13 = arith.constant dense<0.000000e+00> : vector<8x128xf32>
    %18 = tpu.matmul %17, %13, %cst_13 {dimension_numbers = #tpu.dot_dimension_numbers<[1], [0], [0], [1], [0, 0, 1, 1], [], []>} : vector<8x32xbf16>, vector<32x128xbf16>, vector<8x128xf32> -> vector<8x128xf32>
    %19 = arith.addf %16, %18 : vector<8x128xf32>
    %20 = math.tanh %19 : vector<8x128xf32>
    %21 = arith.negf %19 : vector<8x128xf32>
    %22 = math.exp %21 : vector<8x128xf32>
    %cst_14 = arith.constant 1.000000e+00 : f32
    %23 = vector.broadcast %cst_14 : f32 to vector<8x128xf32>
    %24 = arith.addf %23, %22 : vector<8x128xf32>
    %25 = arith.divf %23, %24 : vector<8x128xf32>
    %26 = arith.select %5, %20, %25 : vector<8x128xi1>, vector<8x128xf32>
    %27 = vector.extract_strided_slice %26 {offsets = [0, 0], sizes = [8, 32], strides = [1, 1]} : vector<8x128xf32> to vector<8x32xf32>
    %28 = vector.extract_strided_slice %26 {offsets = [0, 32], sizes = [8, 32], strides = [1, 1]} : vector<8x128xf32> to vector<8x32xf32>
    %29 = vector.extract_strided_slice %26 {offsets = [0, 64], sizes = [8, 32], strides = [1, 1]} : vector<8x128xf32> to vector<8x32xf32>
    %30 = vector.extract_strided_slice %26 {offsets = [0, 96], sizes = [8, 32], strides = [1, 1]} : vector<8x128xf32> to vector<8x32xf32>
    %31 = arith.mulf %28, %15 : vector<8x32xf32>
    %32 = arith.mulf %27, %29 : vector<8x32xf32>
    %33 = arith.addf %31, %32 : vector<8x32xf32>
    %34 = math.tanh %33 : vector<8x32xf32>
    %35 = arith.mulf %30, %34 : vector<8x32xf32>
    %c0_15 = arith.constant 0 : index
    %c0_16 = arith.constant 0 : index
    %36 = vector.load %arg11[%c0_15, %c0_16] : memref<64x32xf32, #tpu.memory_space<vmem>>, vector<8x32xf32>
    tpu.vector_store %arg11[%c0_15, %c0_16], %35 {strides = array<i32>} : memref<64x32xf32, #tpu.memory_space<vmem>>, vector<8x32xf32>,
    %c8 = arith.constant 8 : index
    %c0_17 = arith.constant 0 : index
    %37 = vector.load %arg10[%c8, %c0_17] : memref<64x128xf32, #tpu.memory_space<vmem>>, vector<8x128xf32>
    %38 = arith.truncf %35 : vector<8x32xf32> to vector<8x32xbf16>
    %cst_18 = arith.constant dense<0.000000e+00> : vector<8x128xf32>
    %39 = tpu.matmul %38, %13, %cst_18 {dimension_numbers = #tpu.dot_dimension_numbers<[1], [0], [0], [1], [0, 0, 1, 1], [], []>} : vector<8x32xbf16>, vector<32x128xbf16>, vector<8x128xf32> -> vector<8x128xf32>
    %40 = arith.addf %37, %39 : vector<8x128xf32>
    %41 = math.tanh %40 : vector<8x128xf32>
    %42 = arith.negf %40 : vector<8x128xf32>
    %43 = math.exp %42 : vector<8x128xf32>
    %cst_19 = arith.constant 1.000000e+00 : f32
    %44 = vector.broadcast %cst_19 : f32 to vector<8x128xf32>
    %45 = arith.addf %44, %43 : vector<8x128xf32>
    %46 = arith.divf %44, %45 : vector<8x128xf32>
    %47 = arith.select %5, %41, %46 : vector<8x128xi1>, vector<8x128xf32>
    %48 = vector.extract_strided_slice %47 {offsets = [0, 0], sizes = [8, 32], strides = [1, 1]} : vector<8x128xf32> to vector<8x32xf32>
    %49 = vector.extract_strided_slice %47 {offsets = [0, 32], sizes = [8, 32], strides = [1, 1]} : vector<8x128xf32> to vector<8x32xf32>
    %50 = vector.extract_strided_slice %47 {offsets = [0, 64], sizes = [8, 32], strides = [1, 1]} : vector<8x128xf32> to vector<8x32xf32>
    %51 = vector.extract_strided_slice %47 {offsets = [0, 96], sizes = [8, 32], strides = [1, 1]} : vector<8x128xf32> to vector<8x32xf32>
    %52 = arith.mulf %49, %33 : vector<8x32xf32>
    %53 = arith.mulf %48, %50 : vector<8x32xf32>
    %54 = arith.addf %52, %53 : vector<8x32xf32>
    %55 = math.tanh %54 : vector<8x32xf32>
    %56 = arith.mulf %51, %55 : vector<8x32xf32>
    %c8_20 = arith.constant 8 : index
    %c0_21 = arith.constant 0 : index
    %57 = vector.load %arg11[%c8_20, %c0_21] : memref<64x32xf32, #tpu.memory_space<vmem>>, vector<8x32xf32>
    tpu.vector_store %arg11[%c8_20, %c0_21], %56 {strides = array<i32>} : memref<64x32xf32, #tpu.memory_space<vmem>>, vector<8x32xf32>,
    %c16 = arith.constant 16 : index
    %c0_22 = arith.constant 0 : index
    %58 = vector.load %arg10[%c16, %c0_22] : memref<64x128xf32, #tpu.memory_space<vmem>>, vector<8x128xf32>
    %59 = arith.truncf %56 : vector<8x32xf32> to vector<8x32xbf16>
    %cst_23 = arith.constant dense<0.000000e+00> : vector<8x128xf32>
    %60 = tpu.matmul %59, %13, %cst_23 {dimension_numbers = #tpu.dot_dimension_numbers<[1], [0], [0], [1], [0, 0, 1, 1], [], []>} : vector<8x32xbf16>, vector<32x128xbf16>, vector<8x128xf32> -> vector<8x128xf32>
    %61 = arith.addf %58, %60 : vector<8x128xf32>
    %62 = math.tanh %61 : vector<8x128xf32>
    %63 = arith.negf %61 : vector<8x128xf32>
    %64 = math.exp %63 : vector<8x128xf32>
    %cst_24 = arith.constant 1.000000e+00 : f32
    %65 = vector.broadcast %cst_24 : f32 to vector<8x128xf32>
    %66 = arith.addf %65, %64 : vector<8x128xf32>
    %67 = arith.divf %65, %66 : vector<8x128xf32>
    %68 = arith.select %5, %62, %67 : vector<8x128xi1>, vector<8x128xf32>
    %69 = vector.extract_strided_slice %68 {offsets = [0, 0], sizes = [8, 32], strides = [1, 1]} : vector<8x128xf32> to vector<8x32xf32>
    %70 = vector.extract_strided_slice %68 {offsets = [0, 32], sizes = [8, 32], strides = [1, 1]} : vector<8x128xf32> to vector<8x32xf32>
    %71 = vector.extract_strided_slice %68 {offsets = [0, 64], sizes = [8, 32], strides = [1, 1]} : vector<8x128xf32> to vector<8x32xf32>
    %72 = vector.extract_strided_slice %68 {offsets = [0, 96], sizes = [8, 32], strides = [1, 1]} : vector<8x128xf32> to vector<8x32xf32>
    %73 = arith.mulf %70, %54 : vector<8x32xf32>
    %74 = arith.mulf %69, %71 : vector<8x32xf32>
    %75 = arith.addf %73, %74 : vector<8x32xf32>
    %76 = math.tanh %75 : vector<8x32xf32>
    %77 = arith.mulf %72, %76 : vector<8x32xf32>
    %c16_25 = arith.constant 16 : index
    %c0_26 = arith.constant 0 : index
    %78 = vector.load %arg11[%c16_25, %c0_26] : memref<64x32xf32, #tpu.memory_space<vmem>>, vector<8x32xf32>
    tpu.vector_store %arg11[%c16_25, %c0_26], %77 {strides = array<i32>} : memref<64x32xf32, #tpu.memory_space<vmem>>, vector<8x32xf32>,
    %c24 = arith.constant 24 : index
    %c0_27 = arith.constant 0 : index
    %79 = vector.load %arg10[%c24, %c0_27] : memref<64x128xf32, #tpu.memory_space<vmem>>, vector<8x128xf32>
    %80 = arith.truncf %77 : vector<8x32xf32> to vector<8x32xbf16>
    %cst_28 = arith.constant dense<0.000000e+00> : vector<8x128xf32>
    %81 = tpu.matmul %80, %13, %cst_28 {dimension_numbers = #tpu.dot_dimension_numbers<[1], [0], [0], [1], [0, 0, 1, 1], [], []>} : vector<8x32xbf16>, vector<32x128xbf16>, vector<8x128xf32> -> vector<8x128xf32>
    %82 = arith.addf %79, %81 : vector<8x128xf32>
    %83 = math.tanh %82 : vector<8x128xf32>
    %84 = arith.negf %82 : vector<8x128xf32>
    %85 = math.exp %84 : vector<8x128xf32>
    %cst_29 = arith.constant 1.000000e+00 : f32
    %86 = vector.broadcast %cst_29 : f32 to vector<8x128xf32>
    %87 = arith.addf %86, %85 : vector<8x128xf32>
    %88 = arith.divf %86, %87 : vector<8x128xf32>
    %89 = arith.select %5, %83, %88 : vector<8x128xi1>, vector<8x128xf32>
    %90 = vector.extract_strided_slice %89 {offsets = [0, 0], sizes = [8, 32], strides = [1, 1]} : vector<8x128xf32> to vector<8x32xf32>
    %91 = vector.extract_strided_slice %89 {offsets = [0, 32], sizes = [8, 32], strides = [1, 1]} : vector<8x128xf32> to vector<8x32xf32>
    %92 = vector.extract_strided_slice %89 {offsets = [0, 64], sizes = [8, 32], strides = [1, 1]} : vector<8x128xf32> to vector<8x32xf32>
    %93 = vector.extract_strided_slice %89 {offsets = [0, 96], sizes = [8, 32], strides = [1, 1]} : vector<8x128xf32> to vector<8x32xf32>
    %94 = arith.mulf %91, %75 : vector<8x32xf32>
    %95 = arith.mulf %90, %92 : vector<8x32xf32>
    %96 = arith.addf %94, %95 : vector<8x32xf32>
    %97 = math.tanh %96 : vector<8x32xf32>
    %98 = arith.mulf %93, %97 : vector<8x32xf32>
    %c24_30 = arith.constant 24 : index
    %c0_31 = arith.constant 0 : index
    %99 = vector.load %arg11[%c24_30, %c0_31] : memref<64x32xf32, #tpu.memory_space<vmem>>, vector<8x32xf32>
    tpu.vector_store %arg11[%c24_30, %c0_31], %98 {strides = array<i32>} : memref<64x32xf32, #tpu.memory_space<vmem>>, vector<8x32xf32>,
    %c32 = arith.constant 32 : index
    %c0_32 = arith.constant 0 : index
    %100 = vector.load %arg10[%c32, %c0_32] : memref<64x128xf32, #tpu.memory_space<vmem>>, vector<8x128xf32>
    %101 = arith.truncf %98 : vector<8x32xf32> to vector<8x32xbf16>
    %cst_33 = arith.constant dense<0.000000e+00> : vector<8x128xf32>
    %102 = tpu.matmul %101, %13, %cst_33 {dimension_numbers = #tpu.dot_dimension_numbers<[1], [0], [0], [1], [0, 0, 1, 1], [], []>} : vector<8x32xbf16>, vector<32x128xbf16>, vector<8x128xf32> -> vector<8x128xf32>
    %103 = arith.addf %100, %102 : vector<8x128xf32>
    %104 = math.tanh %103 : vector<8x128xf32>
    %105 = arith.negf %103 : vector<8x128xf32>
    %106 = math.exp %105 : vector<8x128xf32>
    %cst_34 = arith.constant 1.000000e+00 : f32
    %107 = vector.broadcast %cst_34 : f32 to vector<8x128xf32>
    %108 = arith.addf %107, %106 : vector<8x128xf32>
    %109 = arith.divf %107, %108 : vector<8x128xf32>
    %110 = arith.select %5, %104, %109 : vector<8x128xi1>, vector<8x128xf32>
    %111 = vector.extract_strided_slice %110 {offsets = [0, 0], sizes = [8, 32], strides = [1, 1]} : vector<8x128xf32> to vector<8x32xf32>
    %112 = vector.extract_strided_slice %110 {offsets = [0, 32], sizes = [8, 32], strides = [1, 1]} : vector<8x128xf32> to vector<8x32xf32>
    %113 = vector.extract_strided_slice %110 {offsets = [0, 64], sizes = [8, 32], strides = [1, 1]} : vector<8x128xf32> to vector<8x32xf32>
    %114 = vector.extract_strided_slice %110 {offsets = [0, 96], sizes = [8, 32], strides = [1, 1]} : vector<8x128xf32> to vector<8x32xf32>
    %115 = arith.mulf %112, %96 : vector<8x32xf32>
    %116 = arith.mulf %111, %113 : vector<8x32xf32>
    %117 = arith.addf %115, %116 : vector<8x32xf32>
    %118 = math.tanh %117 : vector<8x32xf32>
    %119 = arith.mulf %114, %118 : vector<8x32xf32>
    %c32_35 = arith.constant 32 : index
    %c0_36 = arith.constant 0 : index
    %120 = vector.load %arg11[%c32_35, %c0_36] : memref<64x32xf32, #tpu.memory_space<vmem>>, vector<8x32xf32>
    tpu.vector_store %arg11[%c32_35, %c0_36], %119 {strides = array<i32>} : memref<64x32xf32, #tpu.memory_space<vmem>>, vector<8x32xf32>,
    %c40 = arith.constant 40 : index
    %c0_37 = arith.constant 0 : index
    %121 = vector.load %arg10[%c40, %c0_37] : memref<64x128xf32, #tpu.memory_space<vmem>>, vector<8x128xf32>
    %122 = arith.truncf %119 : vector<8x32xf32> to vector<8x32xbf16>
    %cst_38 = arith.constant dense<0.000000e+00> : vector<8x128xf32>
    %123 = tpu.matmul %122, %13, %cst_38 {dimension_numbers = #tpu.dot_dimension_numbers<[1], [0], [0], [1], [0, 0, 1, 1], [], []>} : vector<8x32xbf16>, vector<32x128xbf16>, vector<8x128xf32> -> vector<8x128xf32>
    %124 = arith.addf %121, %123 : vector<8x128xf32>
    %125 = math.tanh %124 : vector<8x128xf32>
    %126 = arith.negf %124 : vector<8x128xf32>
    %127 = math.exp %126 : vector<8x128xf32>
    %cst_39 = arith.constant 1.000000e+00 : f32
    %128 = vector.broadcast %cst_39 : f32 to vector<8x128xf32>
    %129 = arith.addf %128, %127 : vector<8x128xf32>
    %130 = arith.divf %128, %129 : vector<8x128xf32>
    %131 = arith.select %5, %125, %130 : vector<8x128xi1>, vector<8x128xf32>
    %132 = vector.extract_strided_slice %131 {offsets = [0, 0], sizes = [8, 32], strides = [1, 1]} : vector<8x128xf32> to vector<8x32xf32>
    %133 = vector.extract_strided_slice %131 {offsets = [0, 32], sizes = [8, 32], strides = [1, 1]} : vector<8x128xf32> to vector<8x32xf32>
    %134 = vector.extract_strided_slice %131 {offsets = [0, 64], sizes = [8, 32], strides = [1, 1]} : vector<8x128xf32> to vector<8x32xf32>
    %135 = vector.extract_strided_slice %131 {offsets = [0, 96], sizes = [8, 32], strides = [1, 1]} : vector<8x128xf32> to vector<8x32xf32>
    %136 = arith.mulf %133, %117 : vector<8x32xf32>
    %137 = arith.mulf %132, %134 : vector<8x32xf32>
    %138 = arith.addf %136, %137 : vector<8x32xf32>
    %139 = math.tanh %138 : vector<8x32xf32>
    %140 = arith.mulf %135, %139 : vector<8x32xf32>
    %c40_40 = arith.constant 40 : index
    %c0_41 = arith.constant 0 : index
    %141 = vector.load %arg11[%c40_40, %c0_41] : memref<64x32xf32, #tpu.memory_space<vmem>>, vector<8x32xf32>
    tpu.vector_store %arg11[%c40_40, %c0_41], %140 {strides = array<i32>} : memref<64x32xf32, #tpu.memory_space<vmem>>, vector<8x32xf32>,
    %c48 = arith.constant 48 : index
    %c0_42 = arith.constant 0 : index
    %142 = vector.load %arg10[%c48, %c0_42] : memref<64x128xf32, #tpu.memory_space<vmem>>, vector<8x128xf32>
    %143 = arith.truncf %140 : vector<8x32xf32> to vector<8x32xbf16>
    %cst_43 = arith.constant dense<0.000000e+00> : vector<8x128xf32>
    %144 = tpu.matmul %143, %13, %cst_43 {dimension_numbers = #tpu.dot_dimension_numbers<[1], [0], [0], [1], [0, 0, 1, 1], [], []>} : vector<8x32xbf16>, vector<32x128xbf16>, vector<8x128xf32> -> vector<8x128xf32>
    %145 = arith.addf %142, %144 : vector<8x128xf32>
    %146 = math.tanh %145 : vector<8x128xf32>
    %147 = arith.negf %145 : vector<8x128xf32>
    %148 = math.exp %147 : vector<8x128xf32>
    %cst_44 = arith.constant 1.000000e+00 : f32
    %149 = vector.broadcast %cst_44 : f32 to vector<8x128xf32>
    %150 = arith.addf %149, %148 : vector<8x128xf32>
    %151 = arith.divf %149, %150 : vector<8x128xf32>
    %152 = arith.select %5, %146, %151 : vector<8x128xi1>, vector<8x128xf32>
    %153 = vector.extract_strided_slice %152 {offsets = [0, 0], sizes = [8, 32], strides = [1, 1]} : vector<8x128xf32> to vector<8x32xf32>
    %154 = vector.extract_strided_slice %152 {offsets = [0, 32], sizes = [8, 32], strides = [1, 1]} : vector<8x128xf32> to vector<8x32xf32>
    %155 = vector.extract_strided_slice %152 {offsets = [0, 64], sizes = [8, 32], strides = [1, 1]} : vector<8x128xf32> to vector<8x32xf32>
    %156 = vector.extract_strided_slice %152 {offsets = [0, 96], sizes = [8, 32], strides = [1, 1]} : vector<8x128xf32> to vector<8x32xf32>
    %157 = arith.mulf %154, %138 : vector<8x32xf32>
    %158 = arith.mulf %153, %155 : vector<8x32xf32>
    %159 = arith.addf %157, %158 : vector<8x32xf32>
    %160 = math.tanh %159 : vector<8x32xf32>
    %161 = arith.mulf %156, %160 : vector<8x32xf32>
    %c48_45 = arith.constant 48 : index
    %c0_46 = arith.constant 0 : index
    %162 = vector.load %arg11[%c48_45, %c0_46] : memref<64x32xf32, #tpu.memory_space<vmem>>, vector<8x32xf32>
    tpu.vector_store %arg11[%c48_45, %c0_46], %161 {strides = array<i32>} : memref<64x32xf32, #tpu.memory_space<vmem>>, vector<8x32xf32>,
    %c56 = arith.constant 56 : index
    %c0_47 = arith.constant 0 : index
    %163 = vector.load %arg10[%c56, %c0_47] : memref<64x128xf32, #tpu.memory_space<vmem>>, vector<8x128xf32>
    %164 = arith.truncf %161 : vector<8x32xf32> to vector<8x32xbf16>
    %cst_48 = arith.constant dense<0.000000e+00> : vector<8x128xf32>
    %165 = tpu.matmul %164, %13, %cst_48 {dimension_numbers = #tpu.dot_dimension_numbers<[1], [0], [0], [1], [0, 0, 1, 1], [], []>} : vector<8x32xbf16>, vector<32x128xbf16>, vector<8x128xf32> -> vector<8x128xf32>
    %166 = arith.addf %163, %165 : vector<8x128xf32>
    %167 = math.tanh %166 : vector<8x128xf32>
    %168 = arith.negf %166 : vector<8x128xf32>
    %169 = math.exp %168 : vector<8x128xf32>
    %cst_49 = arith.constant 1.000000e+00 : f32
    %170 = vector.broadcast %cst_49 : f32 to vector<8x128xf32>
    %171 = arith.addf %170, %169 : vector<8x128xf32>
    %172 = arith.divf %170, %171 : vector<8x128xf32>
    %173 = arith.select %5, %167, %172 : vector<8x128xi1>, vector<8x128xf32>
    %174 = vector.extract_strided_slice %173 {offsets = [0, 0], sizes = [8, 32], strides = [1, 1]} : vector<8x128xf32> to vector<8x32xf32>
    %175 = vector.extract_strided_slice %173 {offsets = [0, 32], sizes = [8, 32], strides = [1, 1]} : vector<8x128xf32> to vector<8x32xf32>
    %176 = vector.extract_strided_slice %173 {offsets = [0, 64], sizes = [8, 32], strides = [1, 1]} : vector<8x128xf32> to vector<8x32xf32>
    %177 = vector.extract_strided_slice %173 {offsets = [0, 96], sizes = [8, 32], strides = [1, 1]} : vector<8x128xf32> to vector<8x32xf32>
    %178 = arith.mulf %175, %159 : vector<8x32xf32>
    %179 = arith.mulf %174, %176 : vector<8x32xf32>
    %180 = arith.addf %178, %179 : vector<8x32xf32>
    %181 = math.tanh %180 : vector<8x32xf32>
    %182 = arith.mulf %177, %181 : vector<8x32xf32>
    %c56_50 = arith.constant 56 : index
    %c0_51 = arith.constant 0 : index
    %183 = vector.load %arg11[%c56_50, %c0_51] : memref<64x32xf32, #tpu.memory_space<vmem>>, vector<8x32xf32>
    tpu.vector_store %arg11[%c56_50, %c0_51], %182 {strides = array<i32>} : memref<64x32xf32, #tpu.memory_space<vmem>>, vector<8x32xf32>,
    %c0_52 = arith.constant 0 : index
    %c0_53 = arith.constant 0 : index
    %184 = vector.load %arg11[%c0_52, %c0_53] : memref<64x32xf32, #tpu.memory_space<vmem>>, vector<64x32xf32>
    %185 = arith.truncf %184 : vector<64x32xf32> to vector<64x32xbf16>
    %c0_54 = arith.constant 0 : index
    %c0_55 = arith.constant 0 : index
    %186 = vector.load %arg4[%c0_54, %c0_55] : memref<32x128xbf16, #tpu.memory_space<vmem>>, vector<32x128xbf16>
    %cst_56 = arith.constant dense<0.000000e+00> : vector<64x128xf32>
    %187 = tpu.matmul %185, %186, %cst_56 {dimension_numbers = #tpu.dot_dimension_numbers<[1], [0], [0], [1], [0, 0, 1, 1], [], []>} : vector<64x32xbf16>, vector<32x128xbf16>, vector<64x128xf32> -> vector<64x128xf32>
    %c0_57 = arith.constant 0 : index
    %c0_58 = arith.constant 0 : index
    %188 = vector.load %arg6[%c0_57, %c0_58] : memref<1x128xf32, #tpu.memory_space<vmem>>, vector<1x128xf32>
    %189 = vector.broadcast %188 : vector<1x128xf32> to vector<64x128xf32>
    %190 = arith.addf %187, %189 : vector<64x128xf32>
    %c0_59 = arith.constant 0 : index
    %c0_60 = arith.constant 0 : index
    %191 = vector.load %arg10[%c0_59, %c0_60] : memref<64x128xf32, #tpu.memory_space<vmem>>, vector<64x128xf32>
    tpu.vector_store %arg10[%c0_59, %c0_60], %190 {strides = array<i32>} : memref<64x128xf32, #tpu.memory_space<vmem>>, vector<64x128xf32>,
    %c0_61 = arith.constant 0 : index
    %c0_62 = arith.constant 0 : index
    %192 = vector.load %arg7[%c0_61, %c0_62] : memref<1x32xf32, #tpu.memory_space<vmem>>, vector<1x32xf32>
    %c0_63 = arith.constant 0 : index
    %c0_64 = arith.constant 0 : index
    %193 = vector.load %arg8[%c0_63, %c0_64] : memref<1x1xf32, #tpu.memory_space<vmem>>, vector<1x1xf32>
    %c0_65 = arith.constant 0 : index
    %c0_66 = arith.constant 0 : index
    %194 = vector.load %arg5[%c0_65, %c0_66] : memref<32x128xbf16, #tpu.memory_space<vmem>>, vector<32x128xbf16>
    %cst_67 = arith.constant 0.000000e+00 : f32
    %195 = vector.broadcast %cst_67 : f32 to vector<8x32xf32>
    %cst_68 = arith.constant 0.000000e+00 : f32
    %196 = vector.broadcast %cst_68 : f32 to vector<8x32xf32>
    %c0_69 = arith.constant 0 : index
    %c0_70 = arith.constant 0 : index
    %197 = vector.load %arg10[%c0_69, %c0_70] : memref<64x128xf32, #tpu.memory_space<vmem>>, vector<8x128xf32>
    %198 = arith.truncf %195 : vector<8x32xf32> to vector<8x32xbf16>
    %cst_71 = arith.constant dense<0.000000e+00> : vector<8x128xf32>
    %199 = tpu.matmul %198, %194, %cst_71 {dimension_numbers = #tpu.dot_dimension_numbers<[1], [0], [0], [1], [0, 0, 1, 1], [], []>} : vector<8x32xbf16>, vector<32x128xbf16>, vector<8x128xf32> -> vector<8x128xf32>
    %200 = arith.addf %197, %199 : vector<8x128xf32>
    %201 = math.tanh %200 : vector<8x128xf32>
    %202 = arith.negf %200 : vector<8x128xf32>
    %203 = math.exp %202 : vector<8x128xf32>
    %cst_72 = arith.constant 1.000000e+00 : f32
    %204 = vector.broadcast %cst_72 : f32 to vector<8x128xf32>
    %205 = arith.addf %204, %203 : vector<8x128xf32>
    %206 = arith.divf %204, %205 : vector<8x128xf32>
    %207 = arith.select %5, %201, %206 : vector<8x128xi1>, vector<8x128xf32>
    %208 = vector.extract_strided_slice %207 {offsets = [0, 0], sizes = [8, 32], strides = [1, 1]} : vector<8x128xf32> to vector<8x32xf32>
    %209 = vector.extract_strided_slice %207 {offsets = [0, 32], sizes = [8, 32], strides = [1, 1]} : vector<8x128xf32> to vector<8x32xf32>
    %210 = vector.extract_strided_slice %207 {offsets = [0, 64], sizes = [8, 32], strides = [1, 1]} : vector<8x128xf32> to vector<8x32xf32>
    %211 = vector.extract_strided_slice %207 {offsets = [0, 96], sizes = [8, 32], strides = [1, 1]} : vector<8x128xf32> to vector<8x32xf32>
    %212 = arith.mulf %209, %196 : vector<8x32xf32>
    %213 = arith.mulf %208, %210 : vector<8x32xf32>
    %214 = arith.addf %212, %213 : vector<8x32xf32>
    %215 = math.tanh %214 : vector<8x32xf32>
    %216 = arith.mulf %211, %215 : vector<8x32xf32>
    %217 = vector.broadcast %192 : vector<1x32xf32> to vector<8x32xf32>
    %218 = arith.mulf %216, %217 : vector<8x32xf32>
    %cst_73 = arith.constant dense<0.000000e+00> : vector<8xf32>
    %219 = vector.multi_reduction <add>, %218, %cst_73 [1] : vector<8x32xf32> to vector<8xf32>
    %220 = vector.shape_cast %219 : vector<8xf32> to vector<8x1xf32>
    %221 = vector.broadcast %193 : vector<1x1xf32> to vector<8x1xf32>
    %222 = arith.addf %220, %221 : vector<8x1xf32>
    %c0_74 = arith.constant 0 : index
    %c0_75 = arith.constant 0 : index
    %223 = vector.load %arg9[%c0_74, %c0_75] : memref<64x1xf32, #tpu.memory_space<vmem>>, vector<8x1xf32>
    tpu.vector_store %arg9[%c0_74, %c0_75], %222 {strides = array<i32>} : memref<64x1xf32, #tpu.memory_space<vmem>>, vector<8x1xf32>,
    %c8_76 = arith.constant 8 : index
    %c0_77 = arith.constant 0 : index
    %224 = vector.load %arg10[%c8_76, %c0_77] : memref<64x128xf32, #tpu.memory_space<vmem>>, vector<8x128xf32>
    %225 = arith.truncf %216 : vector<8x32xf32> to vector<8x32xbf16>
    %cst_78 = arith.constant dense<0.000000e+00> : vector<8x128xf32>
    %226 = tpu.matmul %225, %194, %cst_78 {dimension_numbers = #tpu.dot_dimension_numbers<[1], [0], [0], [1], [0, 0, 1, 1], [], []>} : vector<8x32xbf16>, vector<32x128xbf16>, vector<8x128xf32> -> vector<8x128xf32>
    %227 = arith.addf %224, %226 : vector<8x128xf32>
    %228 = math.tanh %227 : vector<8x128xf32>
    %229 = arith.negf %227 : vector<8x128xf32>
    %230 = math.exp %229 : vector<8x128xf32>
    %cst_79 = arith.constant 1.000000e+00 : f32
    %231 = vector.broadcast %cst_79 : f32 to vector<8x128xf32>
    %232 = arith.addf %231, %230 : vector<8x128xf32>
    %233 = arith.divf %231, %232 : vector<8x128xf32>
    %234 = arith.select %5, %228, %233 : vector<8x128xi1>, vector<8x128xf32>
    %235 = vector.extract_strided_slice %234 {offsets = [0, 0], sizes = [8, 32], strides = [1, 1]} : vector<8x128xf32> to vector<8x32xf32>
    %236 = vector.extract_strided_slice %234 {offsets = [0, 32], sizes = [8, 32], strides = [1, 1]} : vector<8x128xf32> to vector<8x32xf32>
    %237 = vector.extract_strided_slice %234 {offsets = [0, 64], sizes = [8, 32], strides = [1, 1]} : vector<8x128xf32> to vector<8x32xf32>
    %238 = vector.extract_strided_slice %234 {offsets = [0, 96], sizes = [8, 32], strides = [1, 1]} : vector<8x128xf32> to vector<8x32xf32>
    %239 = arith.mulf %236, %214 : vector<8x32xf32>
    %240 = arith.mulf %235, %237 : vector<8x32xf32>
    %241 = arith.addf %239, %240 : vector<8x32xf32>
    %242 = math.tanh %241 : vector<8x32xf32>
    %243 = arith.mulf %238, %242 : vector<8x32xf32>
    %244 = vector.broadcast %192 : vector<1x32xf32> to vector<8x32xf32>
    %245 = arith.mulf %243, %244 : vector<8x32xf32>
    %cst_80 = arith.constant dense<0.000000e+00> : vector<8xf32>
    %246 = vector.multi_reduction <add>, %245, %cst_80 [1] : vector<8x32xf32> to vector<8xf32>
    %247 = vector.shape_cast %246 : vector<8xf32> to vector<8x1xf32>
    %248 = vector.broadcast %193 : vector<1x1xf32> to vector<8x1xf32>
    %249 = arith.addf %247, %248 : vector<8x1xf32>
    %c8_81 = arith.constant 8 : index
    %c0_82 = arith.constant 0 : index
    %250 = vector.load %arg9[%c8_81, %c0_82] : memref<64x1xf32, #tpu.memory_space<vmem>>, vector<8x1xf32>
    tpu.vector_store %arg9[%c8_81, %c0_82], %249 {strides = array<i32>} : memref<64x1xf32, #tpu.memory_space<vmem>>, vector<8x1xf32>,
    %c16_83 = arith.constant 16 : index
    %c0_84 = arith.constant 0 : index
    %251 = vector.load %arg10[%c16_83, %c0_84] : memref<64x128xf32, #tpu.memory_space<vmem>>, vector<8x128xf32>
    %252 = arith.truncf %243 : vector<8x32xf32> to vector<8x32xbf16>
    %cst_85 = arith.constant dense<0.000000e+00> : vector<8x128xf32>
    %253 = tpu.matmul %252, %194, %cst_85 {dimension_numbers = #tpu.dot_dimension_numbers<[1], [0], [0], [1], [0, 0, 1, 1], [], []>} : vector<8x32xbf16>, vector<32x128xbf16>, vector<8x128xf32> -> vector<8x128xf32>
    %254 = arith.addf %251, %253 : vector<8x128xf32>
    %255 = math.tanh %254 : vector<8x128xf32>
    %256 = arith.negf %254 : vector<8x128xf32>
    %257 = math.exp %256 : vector<8x128xf32>
    %cst_86 = arith.constant 1.000000e+00 : f32
    %258 = vector.broadcast %cst_86 : f32 to vector<8x128xf32>
    %259 = arith.addf %258, %257 : vector<8x128xf32>
    %260 = arith.divf %258, %259 : vector<8x128xf32>
    %261 = arith.select %5, %255, %260 : vector<8x128xi1>, vector<8x128xf32>
    %262 = vector.extract_strided_slice %261 {offsets = [0, 0], sizes = [8, 32], strides = [1, 1]} : vector<8x128xf32> to vector<8x32xf32>
    %263 = vector.extract_strided_slice %261 {offsets = [0, 32], sizes = [8, 32], strides = [1, 1]} : vector<8x128xf32> to vector<8x32xf32>
    %264 = vector.extract_strided_slice %261 {offsets = [0, 64], sizes = [8, 32], strides = [1, 1]} : vector<8x128xf32> to vector<8x32xf32>
    %265 = vector.extract_strided_slice %261 {offsets = [0, 96], sizes = [8, 32], strides = [1, 1]} : vector<8x128xf32> to vector<8x32xf32>
    %266 = arith.mulf %263, %241 : vector<8x32xf32>
    %267 = arith.mulf %262, %264 : vector<8x32xf32>
    %268 = arith.addf %266, %267 : vector<8x32xf32>
    %269 = math.tanh %268 : vector<8x32xf32>
    %270 = arith.mulf %265, %269 : vector<8x32xf32>
    %271 = vector.broadcast %192 : vector<1x32xf32> to vector<8x32xf32>
    %272 = arith.mulf %270, %271 : vector<8x32xf32>
    %cst_87 = arith.constant dense<0.000000e+00> : vector<8xf32>
    %273 = vector.multi_reduction <add>, %272, %cst_87 [1] : vector<8x32xf32> to vector<8xf32>
    %274 = vector.shape_cast %273 : vector<8xf32> to vector<8x1xf32>
    %275 = vector.broadcast %193 : vector<1x1xf32> to vector<8x1xf32>
    %276 = arith.addf %274, %275 : vector<8x1xf32>
    %c16_88 = arith.constant 16 : index
    %c0_89 = arith.constant 0 : index
    %277 = vector.load %arg9[%c16_88, %c0_89] : memref<64x1xf32, #tpu.memory_space<vmem>>, vector<8x1xf32>
    tpu.vector_store %arg9[%c16_88, %c0_89], %276 {strides = array<i32>} : memref<64x1xf32, #tpu.memory_space<vmem>>, vector<8x1xf32>,
    %c24_90 = arith.constant 24 : index
    %c0_91 = arith.constant 0 : index
    %278 = vector.load %arg10[%c24_90, %c0_91] : memref<64x128xf32, #tpu.memory_space<vmem>>, vector<8x128xf32>
    %279 = arith.truncf %270 : vector<8x32xf32> to vector<8x32xbf16>
    %cst_92 = arith.constant dense<0.000000e+00> : vector<8x128xf32>
    %280 = tpu.matmul %279, %194, %cst_92 {dimension_numbers = #tpu.dot_dimension_numbers<[1], [0], [0], [1], [0, 0, 1, 1], [], []>} : vector<8x32xbf16>, vector<32x128xbf16>, vector<8x128xf32> -> vector<8x128xf32>
    %281 = arith.addf %278, %280 : vector<8x128xf32>
    %282 = math.tanh %281 : vector<8x128xf32>
    %283 = arith.negf %281 : vector<8x128xf32>
    %284 = math.exp %283 : vector<8x128xf32>
    %cst_93 = arith.constant 1.000000e+00 : f32
    %285 = vector.broadcast %cst_93 : f32 to vector<8x128xf32>
    %286 = arith.addf %285, %284 : vector<8x128xf32>
    %287 = arith.divf %285, %286 : vector<8x128xf32>
    %288 = arith.select %5, %282, %287 : vector<8x128xi1>, vector<8x128xf32>
    %289 = vector.extract_strided_slice %288 {offsets = [0, 0], sizes = [8, 32], strides = [1, 1]} : vector<8x128xf32> to vector<8x32xf32>
    %290 = vector.extract_strided_slice %288 {offsets = [0, 32], sizes = [8, 32], strides = [1, 1]} : vector<8x128xf32> to vector<8x32xf32>
    %291 = vector.extract_strided_slice %288 {offsets = [0, 64], sizes = [8, 32], strides = [1, 1]} : vector<8x128xf32> to vector<8x32xf32>
    %292 = vector.extract_strided_slice %288 {offsets = [0, 96], sizes = [8, 32], strides = [1, 1]} : vector<8x128xf32> to vector<8x32xf32>
    %293 = arith.mulf %290, %268 : vector<8x32xf32>
    %294 = arith.mulf %289, %291 : vector<8x32xf32>
    %295 = arith.addf %293, %294 : vector<8x32xf32>
    %296 = math.tanh %295 : vector<8x32xf32>
    %297 = arith.mulf %292, %296 : vector<8x32xf32>
    %298 = vector.broadcast %192 : vector<1x32xf32> to vector<8x32xf32>
    %299 = arith.mulf %297, %298 : vector<8x32xf32>
    %cst_94 = arith.constant dense<0.000000e+00> : vector<8xf32>
    %300 = vector.multi_reduction <add>, %299, %cst_94 [1] : vector<8x32xf32> to vector<8xf32>
    %301 = vector.shape_cast %300 : vector<8xf32> to vector<8x1xf32>
    %302 = vector.broadcast %193 : vector<1x1xf32> to vector<8x1xf32>
    %303 = arith.addf %301, %302 : vector<8x1xf32>
    %c24_95 = arith.constant 24 : index
    %c0_96 = arith.constant 0 : index
    %304 = vector.load %arg9[%c24_95, %c0_96] : memref<64x1xf32, #tpu.memory_space<vmem>>, vector<8x1xf32>
    tpu.vector_store %arg9[%c24_95, %c0_96], %303 {strides = array<i32>} : memref<64x1xf32, #tpu.memory_space<vmem>>, vector<8x1xf32>,
    %c32_97 = arith.constant 32 : index
    %c0_98 = arith.constant 0 : index
    %305 = vector.load %arg10[%c32_97, %c0_98] : memref<64x128xf32, #tpu.memory_space<vmem>>, vector<8x128xf32>
    %306 = arith.truncf %297 : vector<8x32xf32> to vector<8x32xbf16>
    %cst_99 = arith.constant dense<0.000000e+00> : vector<8x128xf32>
    %307 = tpu.matmul %306, %194, %cst_99 {dimension_numbers = #tpu.dot_dimension_numbers<[1], [0], [0], [1], [0, 0, 1, 1], [], []>} : vector<8x32xbf16>, vector<32x128xbf16>, vector<8x128xf32> -> vector<8x128xf32>
    %308 = arith.addf %305, %307 : vector<8x128xf32>
    %309 = math.tanh %308 : vector<8x128xf32>
    %310 = arith.negf %308 : vector<8x128xf32>
    %311 = math.exp %310 : vector<8x128xf32>
    %cst_100 = arith.constant 1.000000e+00 : f32
    %312 = vector.broadcast %cst_100 : f32 to vector<8x128xf32>
    %313 = arith.addf %312, %311 : vector<8x128xf32>
    %314 = arith.divf %312, %313 : vector<8x128xf32>
    %315 = arith.select %5, %309, %314 : vector<8x128xi1>, vector<8x128xf32>
    %316 = vector.extract_strided_slice %315 {offsets = [0, 0], sizes = [8, 32], strides = [1, 1]} : vector<8x128xf32> to vector<8x32xf32>
    %317 = vector.extract_strided_slice %315 {offsets = [0, 32], sizes = [8, 32], strides = [1, 1]} : vector<8x128xf32> to vector<8x32xf32>
    %318 = vector.extract_strided_slice %315 {offsets = [0, 64], sizes = [8, 32], strides = [1, 1]} : vector<8x128xf32> to vector<8x32xf32>
    %319 = vector.extract_strided_slice %315 {offsets = [0, 96], sizes = [8, 32], strides = [1, 1]} : vector<8x128xf32> to vector<8x32xf32>
    %320 = arith.mulf %317, %295 : vector<8x32xf32>
    %321 = arith.mulf %316, %318 : vector<8x32xf32>
    %322 = arith.addf %320, %321 : vector<8x32xf32>
    %323 = math.tanh %322 : vector<8x32xf32>
    %324 = arith.mulf %319, %323 : vector<8x32xf32>
    %325 = vector.broadcast %192 : vector<1x32xf32> to vector<8x32xf32>
    %326 = arith.mulf %324, %325 : vector<8x32xf32>
    %cst_101 = arith.constant dense<0.000000e+00> : vector<8xf32>
    %327 = vector.multi_reduction <add>, %326, %cst_101 [1] : vector<8x32xf32> to vector<8xf32>
    %328 = vector.shape_cast %327 : vector<8xf32> to vector<8x1xf32>
    %329 = vector.broadcast %193 : vector<1x1xf32> to vector<8x1xf32>
    %330 = arith.addf %328, %329 : vector<8x1xf32>
    %c32_102 = arith.constant 32 : index
    %c0_103 = arith.constant 0 : index
    %331 = vector.load %arg9[%c32_102, %c0_103] : memref<64x1xf32, #tpu.memory_space<vmem>>, vector<8x1xf32>
    tpu.vector_store %arg9[%c32_102, %c0_103], %330 {strides = array<i32>} : memref<64x1xf32, #tpu.memory_space<vmem>>, vector<8x1xf32>,
    %c40_104 = arith.constant 40 : index
    %c0_105 = arith.constant 0 : index
    %332 = vector.load %arg10[%c40_104, %c0_105] : memref<64x128xf32, #tpu.memory_space<vmem>>, vector<8x128xf32>
    %333 = arith.truncf %324 : vector<8x32xf32> to vector<8x32xbf16>
    %cst_106 = arith.constant dense<0.000000e+00> : vector<8x128xf32>
    %334 = tpu.matmul %333, %194, %cst_106 {dimension_numbers = #tpu.dot_dimension_numbers<[1], [0], [0], [1], [0, 0, 1, 1], [], []>} : vector<8x32xbf16>, vector<32x128xbf16>, vector<8x128xf32> -> vector<8x128xf32>
    %335 = arith.addf %332, %334 : vector<8x128xf32>
    %336 = math.tanh %335 : vector<8x128xf32>
    %337 = arith.negf %335 : vector<8x128xf32>
    %338 = math.exp %337 : vector<8x128xf32>
    %cst_107 = arith.constant 1.000000e+00 : f32
    %339 = vector.broadcast %cst_107 : f32 to vector<8x128xf32>
    %340 = arith.addf %339, %338 : vector<8x128xf32>
    %341 = arith.divf %339, %340 : vector<8x128xf32>
    %342 = arith.select %5, %336, %341 : vector<8x128xi1>, vector<8x128xf32>
    %343 = vector.extract_strided_slice %342 {offsets = [0, 0], sizes = [8, 32], strides = [1, 1]} : vector<8x128xf32> to vector<8x32xf32>
    %344 = vector.extract_strided_slice %342 {offsets = [0, 32], sizes = [8, 32], strides = [1, 1]} : vector<8x128xf32> to vector<8x32xf32>
    %345 = vector.extract_strided_slice %342 {offsets = [0, 64], sizes = [8, 32], strides = [1, 1]} : vector<8x128xf32> to vector<8x32xf32>
    %346 = vector.extract_strided_slice %342 {offsets = [0, 96], sizes = [8, 32], strides = [1, 1]} : vector<8x128xf32> to vector<8x32xf32>
    %347 = arith.mulf %344, %322 : vector<8x32xf32>
    %348 = arith.mulf %343, %345 : vector<8x32xf32>
    %349 = arith.addf %347, %348 : vector<8x32xf32>
    %350 = math.tanh %349 : vector<8x32xf32>
    %351 = arith.mulf %346, %350 : vector<8x32xf32>
    %352 = vector.broadcast %192 : vector<1x32xf32> to vector<8x32xf32>
    %353 = arith.mulf %351, %352 : vector<8x32xf32>
    %cst_108 = arith.constant dense<0.000000e+00> : vector<8xf32>
    %354 = vector.multi_reduction <add>, %353, %cst_108 [1] : vector<8x32xf32> to vector<8xf32>
    %355 = vector.shape_cast %354 : vector<8xf32> to vector<8x1xf32>
    %356 = vector.broadcast %193 : vector<1x1xf32> to vector<8x1xf32>
    %357 = arith.addf %355, %356 : vector<8x1xf32>
    %c40_109 = arith.constant 40 : index
    %c0_110 = arith.constant 0 : index
    %358 = vector.load %arg9[%c40_109, %c0_110] : memref<64x1xf32, #tpu.memory_space<vmem>>, vector<8x1xf32>
    tpu.vector_store %arg9[%c40_109, %c0_110], %357 {strides = array<i32>} : memref<64x1xf32, #tpu.memory_space<vmem>>, vector<8x1xf32>,
    %c48_111 = arith.constant 48 : index
    %c0_112 = arith.constant 0 : index
    %359 = vector.load %arg10[%c48_111, %c0_112] : memref<64x128xf32, #tpu.memory_space<vmem>>, vector<8x128xf32>
    %360 = arith.truncf %351 : vector<8x32xf32> to vector<8x32xbf16>
    %cst_113 = arith.constant dense<0.000000e+00> : vector<8x128xf32>
    %361 = tpu.matmul %360, %194, %cst_113 {dimension_numbers = #tpu.dot_dimension_numbers<[1], [0], [0], [1], [0, 0, 1, 1], [], []>} : vector<8x32xbf16>, vector<32x128xbf16>, vector<8x128xf32> -> vector<8x128xf32>
    %362 = arith.addf %359, %361 : vector<8x128xf32>
    %363 = math.tanh %362 : vector<8x128xf32>
    %364 = arith.negf %362 : vector<8x128xf32>
    %365 = math.exp %364 : vector<8x128xf32>
    %cst_114 = arith.constant 1.000000e+00 : f32
    %366 = vector.broadcast %cst_114 : f32 to vector<8x128xf32>
    %367 = arith.addf %366, %365 : vector<8x128xf32>
    %368 = arith.divf %366, %367 : vector<8x128xf32>
    %369 = arith.select %5, %363, %368 : vector<8x128xi1>, vector<8x128xf32>
    %370 = vector.extract_strided_slice %369 {offsets = [0, 0], sizes = [8, 32], strides = [1, 1]} : vector<8x128xf32> to vector<8x32xf32>
    %371 = vector.extract_strided_slice %369 {offsets = [0, 32], sizes = [8, 32], strides = [1, 1]} : vector<8x128xf32> to vector<8x32xf32>
    %372 = vector.extract_strided_slice %369 {offsets = [0, 64], sizes = [8, 32], strides = [1, 1]} : vector<8x128xf32> to vector<8x32xf32>
    %373 = vector.extract_strided_slice %369 {offsets = [0, 96], sizes = [8, 32], strides = [1, 1]} : vector<8x128xf32> to vector<8x32xf32>
    %374 = arith.mulf %371, %349 : vector<8x32xf32>
    %375 = arith.mulf %370, %372 : vector<8x32xf32>
    %376 = arith.addf %374, %375 : vector<8x32xf32>
    %377 = math.tanh %376 : vector<8x32xf32>
    %378 = arith.mulf %373, %377 : vector<8x32xf32>
    %379 = vector.broadcast %192 : vector<1x32xf32> to vector<8x32xf32>
    %380 = arith.mulf %378, %379 : vector<8x32xf32>
    %cst_115 = arith.constant dense<0.000000e+00> : vector<8xf32>
    %381 = vector.multi_reduction <add>, %380, %cst_115 [1] : vector<8x32xf32> to vector<8xf32>
    %382 = vector.shape_cast %381 : vector<8xf32> to vector<8x1xf32>
    %383 = vector.broadcast %193 : vector<1x1xf32> to vector<8x1xf32>
    %384 = arith.addf %382, %383 : vector<8x1xf32>
    %c48_116 = arith.constant 48 : index
    %c0_117 = arith.constant 0 : index
    %385 = vector.load %arg9[%c48_116, %c0_117] : memref<64x1xf32, #tpu.memory_space<vmem>>, vector<8x1xf32>
    tpu.vector_store %arg9[%c48_116, %c0_117], %384 {strides = array<i32>} : memref<64x1xf32, #tpu.memory_space<vmem>>, vector<8x1xf32>,
    %c56_118 = arith.constant 56 : index
    %c0_119 = arith.constant 0 : index
    %386 = vector.load %arg10[%c56_118, %c0_119] : memref<64x128xf32, #tpu.memory_space<vmem>>, vector<8x128xf32>
    %387 = arith.truncf %378 : vector<8x32xf32> to vector<8x32xbf16>
    %cst_120 = arith.constant dense<0.000000e+00> : vector<8x128xf32>
    %388 = tpu.matmul %387, %194, %cst_120 {dimension_numbers = #tpu.dot_dimension_numbers<[1], [0], [0], [1], [0, 0, 1, 1], [], []>} : vector<8x32xbf16>, vector<32x128xbf16>, vector<8x128xf32> -> vector<8x128xf32>
    %389 = arith.addf %386, %388 : vector<8x128xf32>
    %390 = math.tanh %389 : vector<8x128xf32>
    %391 = arith.negf %389 : vector<8x128xf32>
    %392 = math.exp %391 : vector<8x128xf32>
    %cst_121 = arith.constant 1.000000e+00 : f32
    %393 = vector.broadcast %cst_121 : f32 to vector<8x128xf32>
    %394 = arith.addf %393, %392 : vector<8x128xf32>
    %395 = arith.divf %393, %394 : vector<8x128xf32>
    %396 = arith.select %5, %390, %395 : vector<8x128xi1>, vector<8x128xf32>
    %397 = vector.extract_strided_slice %396 {offsets = [0, 0], sizes = [8, 32], strides = [1, 1]} : vector<8x128xf32> to vector<8x32xf32>
    %398 = vector.extract_strided_slice %396 {offsets = [0, 32], sizes = [8, 32], strides = [1, 1]} : vector<8x128xf32> to vector<8x32xf32>
    %399 = vector.extract_strided_slice %396 {offsets = [0, 64], sizes = [8, 32], strides = [1, 1]} : vector<8x128xf32> to vector<8x32xf32>
    %400 = vector.extract_strided_slice %396 {offsets = [0, 96], sizes = [8, 32], strides = [1, 1]} : vector<8x128xf32> to vector<8x32xf32>
    %401 = arith.mulf %398, %376 : vector<8x32xf32>
    %402 = arith.mulf %397, %399 : vector<8x32xf32>
    %403 = arith.addf %401, %402 : vector<8x32xf32>
    %404 = math.tanh %403 : vector<8x32xf32>
    %405 = arith.mulf %400, %404 : vector<8x32xf32>
    %406 = vector.broadcast %192 : vector<1x32xf32> to vector<8x32xf32>
    %407 = arith.mulf %405, %406 : vector<8x32xf32>
    %cst_122 = arith.constant dense<0.000000e+00> : vector<8xf32>
    %408 = vector.multi_reduction <add>, %407, %cst_122 [1] : vector<8x32xf32> to vector<8xf32>
    %409 = vector.shape_cast %408 : vector<8xf32> to vector<8x1xf32>
    %410 = vector.broadcast %193 : vector<1x1xf32> to vector<8x1xf32>
    %411 = arith.addf %409, %410 : vector<8x1xf32>
    %c56_123 = arith.constant 56 : index
    %c0_124 = arith.constant 0 : index
    %412 = vector.load %arg9[%c56_123, %c0_124] : memref<64x1xf32, #tpu.memory_space<vmem>>, vector<8x1xf32>
    tpu.vector_store %arg9[%c56_123, %c0_124], %411 {strides = array<i32>} : memref<64x1xf32, #tpu.memory_space<vmem>>, vector<8x1xf32>,
    return
  }
}

</mosaic_0001>

<bundles_post_ra>
// kernel: tpu_custom_call.1
= control target key start
LH: loop header
LB: loop body
LE: loop exit
PB: predicated region body
PF: predicated region fallthrough
CT: control target
= control target key end

     0   :  { %s2616_s0 = inlined_call_operand.vmem [shape: bf16[64,16], index: 0, kind: input, shape index: {}]   ;;  %s2617_s1 = inlined_call_operand.hbm [shape: bf16[16,128], index: 1, kind: input, shape index: {}]   ;;  %s2618_s2 = inlined_call_operand.vmem [shape: bf16[32,128], index: 2, kind: input, shape index: {}]   ;;  %s2619_s3 = inlined_call_operand.vmem [shape: f32[1,128], index: 3, kind: input, shape index: {}]   ;;  %s2620_s4 = inlined_call_operand.vmem [shape: bf16[32,128], index: 4, kind: input, shape index: {}]   ;;  %s2621_s5 = inlined_call_operand.vmem [shape: bf16[32,128], index: 5, kind: input, shape index: {}]   ;;  %s2622_s6 = inlined_call_operand.vmem [shape: f32[1,128], index: 6, kind: input, shape index: {}]   ;;  %s2623_s7 = inlined_call_operand.vmem [shape: f32[1,32], index: 7, kind: input, shape index: {}]   ;;  %s2624_s8 = inlined_call_operand.<no memory space> [shape: f32[1,1], index: 8, kind: input, shape index: {}]   ;;  %s2625_s9 = inlined_call_operand.vmem [shape: f32[64,1], index: 9, kind: output, shape index: {}]  }
   0x1   :  { %v14_v0 = vstv %s2624_s8 }
   0x2   :  { %15 = vst [vmem:[#allocation4] sm:$0x1] %v14_v0 }
   0x3   :  { %16 = vsyncpa [#allocation6], 0  ;;  %s2084_s11 = smov [#allocation5]   ;;  %s2060_s15 = scalar_lea.hbm %s2617_s1, 128 }
   0x4   :  { %s24_s12 = sshll.u32 %s2084_s11, 4  ;;  %p2061_p0 = scmp.ne.s32.totalorder %s2617_s1, %s2060_s15  ;;  %s25_s12 = int_to_ptr.vmem [resolvable:$true] %s24_s12 }
   0x5   :  { %p2064_p1 = scmp.lt.u32.totalorder %s2060_s15, %s2617_s1 }
   0x7   :  { %p2066_p2 = pnand %p2064_p1, %p2061_p0 }
   0x9   :  { %2069 = shalt.err (!%p2066_p2)
}
   0xa   :  { %s2070_s8 = scalar_lea.vmem %s25_s12, 128  ;;  %p2075_p4 = scmp.lt.s32.totalorder %s25_s12, %s25_s12 }
   0xb   :  { %p2071_p3 = scmp.ne.s32.totalorder %s25_s12, %s2070_s8  ;;  %p2076_p5 = scmp.lt.s32.totalorder %s2070_s8, %s2070_s8 }
   0xd   :  { %p2077_p6 = por %p2076_p5, %p2075_p4 }
   0xf   :  { %p2078_p7 = pnand %p2077_p6, %p2071_p3 }
  0x11   :  { %2081 = shalt.err (!%p2078_p7)
}
  0x12   :  { %s2085_s20 = smov 64   ;;  %s2086_s21 = smov 4  }
  0x13   :  { %30 = dma.hbm_to_vmem [thread:$0]  %s2617_s1, 128, %s25_s12, [#allocation6], %s2085_s20, %s2085_s20, %s2086_s21  }
  0x14   :  { %2082 = dma.done.wait [#allocation6], 128  }
  0x15   :  { %2083 = vsyncadd [#allocation6], 4294967168  ;;  %v2087_v1 = vmov 0.0   ;;  %vm2088_vm0 = vmmov 0   ;;  %v1921_v2 = vld [vmem:[#allocation5] sm:$0xff]   ;;  %vm97_vm1 = vcmask 130048   ;;  %v49_v21 = vlaneseq }
  0x16   :  { %1773 = vmatprep.subr.bf16.mxu1 %v2087_v1  ;;  %1777 = vmatprep.mubr.msk.bf16.mxu1 %vm2088_vm0, %v2087_v1  ;;  %v2165_v3 = vld [vmem:[%s2618_s2] sm:$0xff]   ;;  %v1924_v5 = vld [vmem:[%s2616_s0 + $0x8] sm:$0xff]   ;;  %v2089_v7 = vmov 0   ;;  %vm200_vm5 = vcmask 261120   ;;  %v1926_v55 = vld [vmem:[%s2616_s0 + $0x10] sm:$0xff]   ;;  %s2091_s23 = smov 96  }
  0x17   :  { %1763 = vmatprep.subr.bf16.mxu0 %v1921_v2  ;;  %v1923_v4 = vld [vmem:[%s2616_s0] sm:$0xff]   ;;  %1774 = vmatpush3.bf16.msra.mxu1 %v2165_v3  ;;  %v2179_v6 = vld [vmem:[%s2618_s2 + $0x8] sm:$0xff]   ;;  %v50_v23 = vand.u32 127, %v49_v21  ;;  %v1927_v56 = vld [vmem:[%s2616_s0 + $0x18] sm:$0xff]   ;;  %vm1056_vm6 = vcmask 7168  }
  0x18   :  { %1764 = vmatpush3.bf16.msra.mxu0 %v1921_v2  ;;  %1765 = vmatprep.mubr.msk.bf16.mxu0 %vm97_vm1, %v1923_v4  ;;  %v2199_v8 = vld [vmem:[%s2619_s3] ss:$0 sm:$0xff]  ;;  %s2090_s3 = smov 32  }
  0x19   :  { %1775 = vmatprep.subr.bf16.mxu1 %v2087_v1  ;;  %1789 = vmatprep.subr.bf16.mxu0 %v2087_v1  ;;  %vm51_vm2 = vcmp.ge.s32.totalorder %v50_v23, 64  ;;  %vm52_vm3 = vcmp.lt.s32.totalorder %v50_v23, 96 }
  0x1a   :  { %vm2206_vm4 = vmand %vm51_vm2, %vm52_vm3 }
  0x1b   :  { %1766 = vmatmul.mubr.msk.bf16.vlgmr.msra.gmra.mrb[0].mxu0 %vm97_vm1, %v1924_v5  ;;  %1776 = vmatpush3.bf16.msra.mxu1 %v2179_v6 }
  0x1c   :  { %1790 = vmatpush3.bf16.msra.mxu0 %v2165_v3  ;;  %1781 = vmatprep.subr.bf16.mxu1 %v2087_v1 }
  0x1d   :  { %1791 = vmatprep.subr.bf16.mxu0 %v2087_v1  ;;  %1769 = vmatprep.mubr.msk.bf16.mxu0 %vm97_vm1, %v1926_v55 }
  0x1e   :  { %1778 = vmatmul.mubr.bf16.vlgmr.msra.gmra.mrb[0].mxu1 %v2089_v7 }
  0x1f   :  { %1782 = vmatpush3.bf16.msra.mxu1 %v2165_v3  ;;  %1785 = vmatprep.mubr.msk.bf16.mxu1 %vm2088_vm0, %v2087_v1 }
  0x20   :  { %1783 = vmatprep.subr.bf16.mxu1 %v2087_v1  ;;  %1792 = vmatpush3.bf16.msra.mxu0 %v2179_v6 }
  0x21   :  { %1805 = vmatprep.subr.bf16.mxu0 %v2087_v1 }
  0x23   :  { %1784 = vmatpush3.bf16.msra.mxu1 %v2179_v6  ;;  %1770 = vmatmul.mubr.msk.bf16.gmra.mrb[4].mxu0 %vm97_vm1, %v1927_v56 }
  0x24   :  { %1797 = vmatprep.subr.bf16.mxu1 %v2087_v1  ;;  %1793 = vmatprep.mubr.msk.bf16.mxu0 %vm2088_vm0, %v2087_v1 }
  0xee   :  { %v2201_v9 = vpop.f32.mrb[0].mxu0 }
  0xef   :  { %v144_v10 = vpop.f32.mrb[1].mxu0  ;;  %v153_v4 = vadd.f32 %v2201_v9, %v2199_v8 }
  0xf0   :  { %v145_v11 = vadd.f32 %v2199_v8, %v144_v10  ;;  %v2204_v12 = vpop.f32.mrb[2].mxu0 }
  0xf1   :  { %v147_v13 = vpop.f32.mrb[3].mxu0  ;;  %v238_v14 = vpop.f32.mrb[0].mxu1 }
  0xf2   :  { %v244_v15 = vadd.f32 %v238_v14, %v145_v11  ;;  %v1779_v16 = vpop.f32.mrb[1].mxu1  ;;  %v148_v38 = vadd.f32 %v2199_v8, %v147_v13 }
  0xf3   :  { %v241_v17 = vpop.f32.mrb[2].mxu1 }
  0xf4   :  { %v1663_v18 = vmul.f32 -1.442695, %v244_v15  ;;  %v1780_v19 = vpop.f32.mrb[3].mxu1 }
  0xf6   :  { %1932 = vpow2.f32 %v1663_v18  ;;  %v2248_v61 = vpop.f32.mrb[4].mxu0 }
  0xf7   :  { %1934 = vtanh.f32 %v244_v15  ;;  %v2250_v62 = vpop.f32.mrb[5].mxu0 }
  0xf8   :  { %v2252_v63 = vpop.f32.mrb[6].mxu0 }
  0xf9   :  { %v2254_v0 = vpop.f32.mrb[7].mxu0 }
 0x100   :  { %v1933_v20 = vpop.eup %1932 }
 0x101   :  { %v249_v22 = vadd.f32 1.0, %v1933_v20  ;;  %v1935_v25 = vpop.eup %1934 }
 0x103   :  { %1936 = vrcp.f32 %v249_v22 }
 0x10d   :  { %v1937_v26 = vpop.eup %1936 }
 0x10e   :  { %v252_v27 = vsel %vm2206_vm4, %v1935_v25, %v1937_v26 }
 0x10f   :  { %255 = vrot.lane.b32.xlu0 %v252_v27, %s2085_s20  ;;  %v253_v30 = vmul.f32 0.0, %v252_v27 }
 0x181   :  { %v256_v28 = vpop.permute.xlu0 %255 }
 0x182   :  { %v258_v29 = vmul.f32 %v256_v28, %v252_v27 }
 0x184   :  { %260 = vrot.lane.b32.xlu0 %v258_v29, %s2090_s3 }
 0x1f6   :  { %v261_v31 = vpop.permute.xlu0 %260 }
 0x1f7   :  { %v263_v32 = vadd.f32 %v261_v31, %v253_v30  ;;  %v156_v31 = vadd.f32 %v2204_v12, %v2199_v8 }
 0x1f9   :  { %1938 = vtanh.f32 %v263_v32 }
 0x203   :  { %v1939_v33 = vpop.eup %1938 }
 0x204   :  { %266 = vrot.lane.b32.xlu1 %v1939_v33, %s2085_s20 }
 0x276   :  { %v267_v34 = vpop.permute.xlu1 %266 }
 0x277   :  { %v2215_v35 = vmul.f32 %v267_v34, %v252_v27 }
 0x279   :  { %v276_v36 = vpack.c.bf16 %v2215_v35, %v2215_v35 }
 0x27b   :  { %278 = vrot.lane.b32.xlu1 %v276_v36, %s2090_s3 }
 0x2ed   :  { %v279_v37 = vpop.permute.xlu1 %278 }
 0x2ee   :  { %1786 = vmatmul.mubr.msk.bf16.vlgmr.msra.gmra.mrb[4].mxu1 %vm200_vm5, %v279_v37 }
 0x2ef   :  { %1798 = vmatpush3.bf16.msra.mxu1 %v2165_v3  ;;  %1801 = vmatprep.mubr.msk.bf16.mxu1 %vm2088_vm0, %v2087_v1 }
 0x2f0   :  { %1799 = vmatprep.subr.bf16.mxu1 %v2087_v1 }
 0x2f3   :  { %1800 = vmatpush3.bf16.msra.mxu1 %v2179_v6 }
 0x2f4   :  { %1813 = vmatprep.subr.bf16.mxu1 %v2087_v1 }
 0x3c1   :  { %v317_v39 = vpop.f32.mrb[4].mxu1 }
 0x3c2   :  { %v323_v40 = vadd.f32 %v317_v39, %v148_v38  ;;  %v1787_v41 = vpop.f32.mrb[5].mxu1 }
 0x3c3   :  { %v320_v42 = vpop.f32.mrb[6].mxu1 }
 0x3c4   :  { %v1665_v43 = vmul.f32 -1.442695, %v323_v40  ;;  %v1788_v44 = vpop.f32.mrb[7].mxu1 }
 0x3c6   :  { %1940 = vpow2.f32 %v1665_v43 }
 0x3c7   :  { %1942 = vtanh.f32 %v323_v40 }
 0x3d0   :  { %v1941_v45 = vpop.eup %1940 }
 0x3d1   :  { %v328_v46 = vadd.f32 1.0, %v1941_v45  ;;  %v1943_v47 = vpop.eup %1942 }
 0x3d3   :  { %1944 = vrcp.f32 %v328_v46 }
 0x3dd   :  { %v1945_v48 = vpop.eup %1944 }
 0x3de   :  { %v331_v49 = vsel %vm2206_vm4, %v1943_v47, %v1945_v48 }
 0x3df   :  { %334 = vrot.lane.b32.xlu0 %v331_v49, %s2085_s20  ;;  %v332_v52 = vmul.f32 %v331_v49, %v263_v32 }
 0x451   :  { %v335_v50 = vpop.permute.xlu0 %334 }
 0x452   :  { %v337_v51 = vmul.f32 %v335_v50, %v331_v49 }
 0x454   :  { %339 = vrot.lane.b32.xlu1 %v337_v51, %s2090_s3 }
 0x4c6   :  { %v340_v53 = vpop.permute.xlu1 %339 }
 0x4c7   :  { %v342_v54 = vadd.f32 %v340_v53, %v332_v52  ;;  %v161_v53 = vadd.f32 %v2199_v8, %v2250_v62 }
 0x4c9   :  { %1946 = vtanh.f32 %v342_v54 }
 0x4d3   :  { %v1947_v57 = vpop.eup %1946 }
 0x4d4   :  { %345 = vrot.lane.b32.xlu0 %v1947_v57, %s2085_s20 }
 0x546   :  { %v346_v58 = vpop.permute.xlu0 %345 }
 0x547   :  { %v2243_v59 = vmul.f32 %v346_v58, %v331_v49 }
 0x549   :  { %v355_v60 = vpack.c.bf16 %v2243_v59, %v2243_v59 }
 0x54b   :  { %357 = vrot.lane.b32.xlu1 %v355_v60, %s2090_s3 }
 0x5bd   :  { %v358_v2 = vpop.permute.xlu1 %357 }
 0x5be   :  { %1794 = vmatmul.mubr.msk.bf16.vlgmr.msra.gmra.mrb[8].mxu0 %vm200_vm5, %v358_v2 }
 0x5bf   :  { %1806 = vmatpush3.bf16.msra.mxu0 %v2165_v3  ;;  %1809 = vmatprep.mubr.msk.bf16.mxu0 %vm2088_vm0, %v2087_v1 }
 0x5c0   :  { %1807 = vmatprep.subr.bf16.mxu0 %v2087_v1 }
 0x5c3   :  { %1808 = vmatpush3.bf16.msra.mxu0 %v2179_v6 }
 0x5c4   :  { %1821 = vmatprep.subr.bf16.mxu0 %v2087_v1 }
 0x691   :  { %v396_v5 = vpop.f32.mrb[8].mxu0 }
 0x692   :  { %v402_v10 = vadd.f32 %v396_v5, %v153_v4  ;;  %v1795_v11 = vpop.f32.mrb[9].mxu0 }
 0x693   :  { %v399_v13 = vpop.f32.mrb[10].mxu0 }
 0x694   :  { %v1667_v14 = vmul.f32 -1.442695, %v402_v10  ;;  %v1796_v15 = vpop.f32.mrb[11].mxu0 }
 0x696   :  { %1948 = vpow2.f32 %v1667_v14 }
 0x697   :  { %1950 = vtanh.f32 %v402_v10 }
 0x6a0   :  { %v1949_v16 = vpop.eup %1948 }
 0x6a1   :  { %v407_v17 = vadd.f32 1.0, %v1949_v16  ;;  %v1951_v18 = vpop.eup %1950 }
 0x6a3   :  { %1952 = vrcp.f32 %v407_v17 }
 0x6ad   :  { %v1953_v19 = vpop.eup %1952 }
 0x6ae   :  { %v410_v20 = vsel %vm2206_vm4, %v1951_v18, %v1953_v19 }
 0x6af   :  { %413 = vrot.lane.b32.xlu0 %v410_v20, %s2085_s20  ;;  %v411_v22 = vmul.f32 %v410_v20, %v342_v54 }
 0x721   :  { %v414_v21 = vpop.permute.xlu0 %413 }
 0x722   :  { %v416_v9 = vmul.f32 %v414_v21, %v410_v20 }
 0x724   :  { %418 = vrot.lane.b32.xlu1 %v416_v9, %s2090_s3  ;;  %v164_v9 = vadd.f32 %v2199_v8, %v2254_v0 }
 0x796   :  { %v419_v23 = vpop.permute.xlu1 %418 }
 0x797   :  { %v421_v25 = vadd.f32 %v419_v23, %v411_v22 }
 0x799   :  { %1954 = vtanh.f32 %v421_v25 }
 0x7a3   :  { %v1955_v26 = vpop.eup %1954 }
 0x7a4   :  { %424 = vrot.lane.b32.xlu0 %v1955_v26, %s2085_s20 }
 0x816   :  { %v425_v27 = vpop.permute.xlu0 %424 }
 0x817   :  { %v2270_v28 = vmul.f32 %v425_v27, %v410_v20 }
 0x819   :  { %v434_v29 = vpack.c.bf16 %v2270_v28, %v2270_v28 }
 0x81b   :  { %436 = vrot.lane.b32.xlu1 %v434_v29, %s2090_s3 }
 0x88d   :  { %v437_v30 = vpop.permute.xlu1 %436 }
 0x88e   :  { %1802 = vmatmul.mubr.msk.bf16.vlgmr.msra.gmra.mrb[8].mxu1 %vm200_vm5, %v437_v30 }
 0x88f   :  { %1814 = vmatpush3.bf16.msra.mxu1 %v2165_v3  ;;  %1817 = vmatprep.mubr.msk.bf16.mxu1 %vm2088_vm0, %v2087_v1 }
 0x890   :  { %1815 = vmatprep.subr.bf16.mxu1 %v2087_v1 }
 0x893   :  { %1816 = vmatpush3.bf16.msra.mxu1 %v2179_v6 }
 0x894   :  { %1829 = vmatprep.subr.bf16.mxu1 %v2087_v1 }
 0x961   :  { %v475_v32 = vpop.f32.mrb[8].mxu1 }
 0x962   :  { %v481_v33 = vadd.f32 %v475_v32, %v156_v31  ;;  %v1803_v34 = vpop.f32.mrb[9].mxu1 }
 0x963   :  { %v478_v36 = vpop.f32.mrb[10].mxu1 }
 0x964   :  { %v1669_v37 = vmul.f32 -1.442695, %v481_v33  ;;  %v1804_v38 = vpop.f32.mrb[11].mxu1 }
 0x966   :  { %1956 = vpow2.f32 %v1669_v37 }
 0x967   :  { %1958 = vtanh.f32 %v481_v33 }
 0x970   :  { %v1957_v39 = vpop.eup %1956 }
 0x971   :  { %v486_v40 = vadd.f32 1.0, %v1957_v39  ;;  %v1959_v41 = vpop.eup %1958 }
 0x973   :  { %1960 = vrcp.f32 %v486_v40 }
 0x97d   :  { %v1961_v42 = vpop.eup %1960 }
 0x97e   :  { %v489_v43 = vsel %vm2206_vm4, %v1959_v41, %v1961_v42 }
 0x97f   :  { %492 = vrot.lane.b32.xlu0 %v489_v43, %s2085_s20  ;;  %v490_v45 = vmul.f32 %v489_v43, %v421_v25 }
 0x9f1   :  { %v493_v44 = vpop.permute.xlu0 %492 }
 0x9f2   :  { %v495_v12 = vmul.f32 %v493_v44, %v489_v43 }
 0x9f4   :  { %497 = vrot.lane.b32.xlu1 %v495_v12, %s2090_s3 }
 0xa66   :  { %v498_v46 = vpop.permute.xlu1 %497 }
 0xa67   :  { %v500_v47 = vadd.f32 %v498_v46, %v490_v45 }
 0xa69   :  { %1962 = vtanh.f32 %v500_v47 }
 0xa73   :  { %v1963_v48 = vpop.eup %1962 }
 0xa74   :  { %503 = vrot.lane.b32.xlu0 %v1963_v48, %s2085_s20 }
 0xae6   :  { %v504_v49 = vpop.permute.xlu0 %503 }
 0xae7   :  { %v2289_v50 = vmul.f32 %v504_v49, %v489_v43  ;;  %v169_v43 = vadd.f32 %v2248_v61, %v2199_v8 }
 0xae9   :  { %v513_v51 = vpack.c.bf16 %v2289_v50, %v2289_v50 }
 0xaeb   :  { %515 = vrot.lane.b32.xlu1 %v513_v51, %s2090_s3 }
 0xb5d   :  { %v516_v52 = vpop.permute.xlu1 %515 }
 0xb5e   :  { %1810 = vmatmul.mubr.msk.bf16.vlgmr.msra.gmra.mrb[12].mxu0 %vm200_vm5, %v516_v52 }
 0xb5f   :  { %1822 = vmatpush3.bf16.msra.mxu0 %v2165_v3  ;;  %1825 = vmatprep.mubr.msk.bf16.mxu0 %vm2088_vm0, %v2087_v1 }
 0xb60   :  { %1823 = vmatprep.subr.bf16.mxu0 %v2087_v1 }
 0xb63   :  { %1824 = vmatpush3.bf16.msra.mxu0 %v2179_v6 }
 0xc31   :  { %v554_v54 = vpop.f32.mrb[12].mxu0 }
 0xc32   :  { %v560_v55 = vadd.f32 %v554_v54, %v161_v53  ;;  %v1811_v56 = vpop.f32.mrb[13].mxu0 }
 0xc33   :  { %v557_v57 = vpop.f32.mrb[14].mxu0 }
 0xc34   :  { %v1671_v58 = vmul.f32 -1.442695, %v560_v55  ;;  %v1812_v60 = vpop.f32.mrb[15].mxu0 }
 0xc36   :  { %1964 = vpow2.f32 %v1671_v58 }
 0xc37   :  { %1966 = vtanh.f32 %v560_v55 }
 0xc40   :  { %v1965_v2 = vpop.eup %1964 }
 0xc41   :  { %v565_v4 = vadd.f32 1.0, %v1965_v2  ;;  %v1967_v5 = vpop.eup %1966 }
 0xc43   :  { %1968 = vrcp.f32 %v565_v4  ;;  %v1928_v4 = vld [vmem:[%s2620_s4] sm:$0xff]  }
 0xc44   :  { %1837 = vmatprep.subr.bf16.mxu0 %v1928_v4 }
 0xc4d   :  { %v1969_v10 = vpop.eup %1968 }
 0xc4e   :  { %v568_v11 = vsel %vm2206_vm4, %v1967_v5, %v1969_v10 }
 0xc4f   :  { %571 = vrot.lane.b32.xlu0 %v568_v11, %s2085_s20  ;;  %v569_v14 = vmul.f32 %v568_v11, %v500_v47 }
 0xcc1   :  { %v572_v13 = vpop.permute.xlu0 %571 }
 0xcc2   :  { %v574_v62 = vmul.f32 %v572_v13, %v568_v11 }
 0xcc4   :  { %576 = vrot.lane.b32.xlu1 %v574_v62, %s2090_s3 }
 0xd36   :  { %v577_v15 = vpop.permute.xlu1 %576 }
 0xd37   :  { %v579_v16 = vadd.f32 %v577_v15, %v569_v14 }
 0xd39   :  { %1970 = vtanh.f32 %v579_v16 }
 0xd43   :  { %v1971_v17 = vpop.eup %1970 }
 0xd44   :  { %582 = vrot.lane.b32.xlu0 %v1971_v17, %s2085_s20 }
 0xdb6   :  { %v583_v18 = vpop.permute.xlu0 %582 }
 0xdb7   :  { %v2307_v19 = vmul.f32 %v583_v18, %v568_v11  ;;  %v2370_v18 = vld [vmem:[%s2621_s5] sm:$0xff]  }
 0xdb9   :  { %v592_v20 = vpack.c.bf16 %v2307_v19, %v2307_v19 }
 0xdbb   :  { %594 = vrot.lane.b32.xlu1 %v592_v20, %s2090_s3  ;;  %v2378_v20 = vld [vmem:[%s2621_s5 + $0x8] sm:$0xff]  }
 0xe2d   :  { %v595_v21 = vpop.permute.xlu1 %594 }
 0xe2e   :  { %1818 = vmatmul.mubr.msk.bf16.vlgmr.msra.gmra.mrb[12].mxu1 %vm200_vm5, %v595_v21 }
 0xe2f   :  { %1830 = vmatpush3.bf16.msra.mxu1 %v2165_v3  ;;  %1833 = vmatprep.mubr.msk.bf16.mxu1 %vm2088_vm0, %v2087_v1 }
 0xe30   :  { %1831 = vmatprep.subr.bf16.mxu1 %v2087_v1 }
 0xe33   :  { %1832 = vmatpush3.bf16.msra.mxu1 %v2179_v6 }
 0xe34   :  { %1849 = vmatprep.subr.bf16.mxu1 %v2087_v1 }
 0xf01   :  { %v633_v22 = vpop.f32.mrb[12].mxu1 }
 0xf02   :  { %v639_v23 = vadd.f32 %v633_v22, %v164_v9  ;;  %v1819_v25 = vpop.f32.mrb[13].mxu1 }
 0xf03   :  { %v636_v26 = vpop.f32.mrb[14].mxu1 }
 0xf04   :  { %v1673_v27 = vmul.f32 -1.442695, %v639_v23  ;;  %v1820_v29 = vpop.f32.mrb[15].mxu1 }
 0xf06   :  { %1972 = vpow2.f32 %v1673_v27 }
 0xf07   :  { %1974 = vtanh.f32 %v639_v23 }
 0xf10   :  { %v1973_v3 = vpop.eup %1972 }
 0xf11   :  { %v644_v30 = vadd.f32 1.0, %v1973_v3  ;;  %v1975_v31 = vpop.eup %1974 }
 0xf13   :  { %1976 = vrcp.f32 %v644_v30 }
 0xf1d   :  { %v1977_v32 = vpop.eup %1976 }
 0xf1e   :  { %v647_v6 = vsel %vm2206_vm4, %v1975_v31, %v1977_v32  ;;  %v2407_v31 = vld [vmem:[%s2622_s6] ss:$0 sm:$0xff] }
 0xf1f   :  { %650 = vrot.lane.b32.xlu0 %v647_v6, %s2085_s20  ;;  %v648_v34 = vmul.f32 %v647_v6, %v579_v16 }
 0xf91   :  { %v651_v33 = vpop.permute.xlu0 %650 }
 0xf92   :  { %v653_v0 = vmul.f32 %v651_v33, %v647_v6 }
 0xf94   :  { %655 = vrot.lane.b32.xlu1 %v653_v0, %s2090_s3 }
0x1006   :  { %v656_v36 = vpop.permute.xlu1 %655 }
0x1007   :  { %v658_v37 = vadd.f32 %v656_v36, %v648_v34 }
0x1009   :  { %1978 = vtanh.f32 %v658_v37 }
0x1013   :  { %v1979_v38 = vpop.eup %1978 }
0x1014   :  { %661 = vrot.lane.b32.xlu0 %v1979_v38, %s2085_s20 }
0x1086   :  { %v662_v39 = vpop.permute.xlu0 %661 }
0x1087   :  { %v2326_v40 = vmul.f32 %v662_v39, %v647_v6 }
0x1089   :  { %v671_v41 = vpack.c.bf16 %v2326_v40, %v2326_v40 }
0x108b   :  { %673 = vrot.lane.b32.xlu1 %v671_v41, %s2090_s3 }
0x10fd   :  { %v674_v42 = vpop.permute.xlu1 %673 }
0x10fe   :  { %1826 = vmatmul.mubr.msk.bf16.vlgmr.msra.gmra.mrb[16].mxu0 %vm200_vm5, %v674_v42 }
0x10ff   :  { %1838 = vmatpush3.bf16.msra.mxu0 %v1928_v4 }
0x11d1   :  { %v712_v44 = vpop.f32.mrb[16].mxu0 }
0x11d2   :  { %v718_v12 = vadd.f32 %v712_v44, %v169_v43  ;;  %v1827_v45 = vpop.f32.mrb[17].mxu0 }
0x11d3   :  { %v715_v46 = vpop.f32.mrb[18].mxu0 }
0x11d4   :  { %v1675_v47 = vmul.f32 -1.442695, %v718_v12  ;;  %v1828_v48 = vpop.f32.mrb[19].mxu0 }
0x11d6   :  { %1980 = vpow2.f32 %v1675_v47 }
0x11d7   :  { %1982 = vtanh.f32 %v718_v12 }
0x11e0   :  { %v1981_v49 = vpop.eup %1980 }
0x11e1   :  { %v723_v51 = vadd.f32 1.0, %v1981_v49  ;;  %v1983_v52 = vpop.eup %1982 }
0x11e3   :  { %1984 = vrcp.f32 %v723_v51 }
0x11ed   :  { %v1985_v53 = vpop.eup %1984 }
0x11ee   :  { %v726_v54 = vsel %vm2206_vm4, %v1983_v52, %v1985_v53 }
0x11ef   :  { %729 = vrot.lane.b32.xlu0 %v726_v54, %s2085_s20  ;;  %v727_v56 = vmul.f32 %v726_v54, %v658_v37 }
0x1261   :  { %v730_v55 = vpop.permute.xlu0 %729 }
0x1262   :  { %v732_v61 = vmul.f32 %v730_v55, %v726_v54 }
0x1264   :  { %734 = vrot.lane.b32.xlu1 %v732_v61, %s2090_s3 }
0x1268   :  { %271 = vrot.lane.b32.xlu1 %v2215_v35, %s2090_s3  ;;  %v1929_v35 = vld [vmem:[%s2620_s4 + $0x8] sm:$0xff]  }
0x1269   :  { %1839 = vmatprep.subr.bf16.mxu0 %v1929_v35 }
0x126a   :  { %1840 = vmatpush3.bf16.msra.mxu0 %v1929_v35 }
0x126b   :  { %1865 = vmatprep.subr.bf16.mxu0 %v2087_v1 }
0x126c   :  { %429 = vrot.lane.b32.xlu1 %v2270_v28, %s2090_s3 }
0x12d6   :  { %v735_v57 = vpop.permute.xlu1 %734 }
0x12d7   :  { %v2342_v58 = vadd.f32 %v735_v57, %v727_v56 }
0x12d9   :  { %1986 = vtanh.f32 %v2342_v58 }
0x12da   :  { %v272_v60 = vpop.permute.xlu1 %271 }
0x12db   :  { %274 = vst.msk [vmem:[#allocation3] sm:$0xff] %vm200_vm5, %v272_v60 }
0x12de   :  { %v430_v2 = vpop.permute.xlu1 %429 }
0x12df   :  { %432 = vst.msk [vmem:[#allocation3 + $0x10] sm:$0xff] %vm200_vm5, %v430_v2 }
0x12e2   :  { %v828_v14 = vld [vmem:[#allocation3] sm:$0xff] }
0x12e3   :  { %v1987_v28 = vpop.eup %1986 }
0x12e4   :  { %740 = vrot.lane.b32.xlu0 %v1987_v28, %s2085_s20 }
0x12e8   :  { %350 = vrot.lane.b32.xlu0 %v2243_v59, %s2090_s3 }
0x12ec   :  { %508 = vrot.lane.b32.xlu0 %v2289_v50, %s2090_s3  ;;  %v830_v50 = vld [vmem:[#allocation3 + $0x10] sm:$0xff] }
0x1356   :  { %v741_v5 = vpop.permute.xlu0 %740 }
0x1357   :  { %v2359_v10 = vmul.f32 %v741_v5, %v726_v54 }
0x1359   :  { %v750_v11 = vpack.c.bf16 %v2359_v10, %v2359_v10 }
0x135a   :  { %v351_v13 = vpop.permute.xlu0 %350 }
0x135b   :  { %353 = vst.msk [vmem:[#allocation3 + $0x8] sm:$0xff] %vm200_vm5, %v351_v13  ;;  %752 = vrot.lane.b32.xlu1 %v750_v11, %s2090_s3 }
0x135e   :  { %v509_v62 = vpop.permute.xlu0 %508 }
0x135f   :  { %511 = vst.msk [vmem:[#allocation3 + $0x18] sm:$0xff] %vm200_vm5, %v509_v62 }
0x1362   :  { %v829_v15 = vld [vmem:[#allocation3 + $0x8] sm:$0xff] }
0x1363   :  { %v836_v59 = vpack.c.bf16 %v829_v15, %v828_v14 }
0x1365   :  { %1841 = vmatprep.mubr.msk.bf16.mxu0 %vm200_vm5, %v836_v59 }
0x1366   :  { %v831_v16 = vld [vmem:[#allocation3 + $0x18] sm:$0xff] }
0x1367   :  { %v837_v17 = vpack.c.bf16 %v831_v16, %v830_v50 }
0x1369   :  { %1842 = vmatmul.mubr.msk.bf16.vlgmr.msra.gmra.mrb[20].mxu0 %vm200_vm5, %v837_v17 }
0x136a   :  { %1866 = vmatpush3.bf16.msra.mxu0 %v2370_v18 }
0x136b   :  { %1867 = vmatprep.subr.bf16.mxu0 %v2087_v1 }
0x136e   :  { %1868 = vmatpush3.bf16.msra.mxu0 %v2378_v20 }
0x136f   :  { %1881 = vmatprep.subr.bf16.mxu0 %v2087_v1 }
0x13cd   :  { %v753_v21 = vpop.permute.xlu1 %752 }
0x13ce   :  { %1834 = vmatmul.mubr.msk.bf16.vlgmr.msra.gmra.mrb[16].mxu1 %vm200_vm5, %v753_v21 }
0x13cf   :  { %1850 = vmatpush3.bf16.msra.mxu1 %v2370_v18  ;;  %1853 = vmatprep.mubr.msk.bf16.mxu1 %vm2088_vm0, %v2087_v1 }
0x13d0   :  { %1851 = vmatprep.subr.bf16.mxu1 %v2087_v1 }
0x13d3   :  { %1852 = vmatpush3.bf16.msra.mxu1 %v2378_v20 }
0x13d4   :  { %1857 = vmatprep.subr.bf16.mxu1 %v2087_v1 }
0x13d6   :  { %1854 = vmatmul.mubr.bf16.vlgmr.msra.gmra.mrb[20].mxu1 %v2089_v7  ;;  %v172_v7 = vadd.f32 %v2252_v63, %v2199_v8 }
0x13d7   :  { %1858 = vmatpush3.bf16.msra.mxu1 %v2370_v18  ;;  %1861 = vmatprep.mubr.msk.bf16.mxu1 %vm2088_vm0, %v2087_v1 }
0x13d8   :  { %1859 = vmatprep.subr.bf16.mxu1 %v2087_v1 }
0x13db   :  { %1860 = vmatpush3.bf16.msra.mxu1 %v2378_v20 }
0x13dc   :  { %1873 = vmatprep.subr.bf16.mxu1 %v2087_v1 }
0x143c   :  { %v2396_v9 = vpop.f32.mrb[20].mxu0 }
0x143d   :  { %v909_v22 = vpop.f32.mrb[21].mxu0 }
0x143e   :  { %v2398_v23 = vpop.f32.mrb[22].mxu0  ;;  %v910_v32 = vadd.f32 %v2407_v31, %v909_v22 }
0x143f   :  { %v2400_v25 = vpop.f32.mrb[23].mxu0 }
0x1440   :  { %v913_v13 = vadd.f32 %v2407_v31, %v2400_v25 }
0x14a1   :  { %v791_v26 = vpop.f32.mrb[16].mxu1 }
0x14a2   :  { %v797_v27 = vadd.f32 %v791_v26, %v172_v7  ;;  %v1835_v29 = vpop.f32.mrb[17].mxu1 }
0x14a3   :  { %v794_v3 = vpop.f32.mrb[18].mxu1 }
0x14a4   :  { %v1836_v30 = vpop.f32.mrb[19].mxu1  ;;  %v1677_v44 = vmul.f32 -1.442695, %v797_v27 }
0x14a9   :  { %v1001_v6 = vpop.f32.mrb[20].mxu1 }
0x14aa   :  { %v1007_v33 = vadd.f32 %v1001_v6, %v910_v32  ;;  %v1855_v0 = vpop.f32.mrb[21].mxu1 }
0x14ab   :  { %v1004_v34 = vpop.f32.mrb[22].mxu1 }
0x14ac   :  { %v1687_v36 = vmul.f32 -1.442695, %v1007_v33  ;;  %v1856_v37 = vpop.f32.mrb[23].mxu1 }
0x14ae   :  { %1988 = vpow2.f32 %v1687_v36 }
0x14af   :  { %1990 = vtanh.f32 %v1007_v33 }
0x14b8   :  { %v1989_v8 = vpop.eup %1988 }
0x14b9   :  { %v1012_v63 = vadd.f32 1.0, %v1989_v8  ;;  %v1991_v38 = vpop.eup %1990 }
0x14bb   :  { %1992 = vrcp.f32 %v1012_v63 }
0x14bc   :  { %1994 = vpow2.f32 %v1677_v44 }
0x14c5   :  { %v1993_v39 = vpop.eup %1992 }
0x14c6   :  { %v1015_v41 = vsel %vm2206_vm4, %v1991_v38, %v1993_v39  ;;  %v1995_v12 = vpop.eup %1994 }
0x14c7   :  { %1018 = vrot.lane.b32.xlu0 %v1015_v41, %s2085_s20  ;;  %v1016_v45 = vmul.f32 0.0, %v1015_v41  ;;  %v802_v46 = vadd.f32 1.0, %v1995_v12  ;;  %v918_v12 = vadd.f32 %v2396_v9, %v2407_v31 }
0x1539   :  { %v1019_v42 = vpop.permute.xlu0 %1018 }
0x153a   :  { %v1021_v43 = vmul.f32 %v1019_v42, %v1015_v41 }
0x153c   :  { %1023 = vrot.lane.b32.xlu1 %v1021_v43, %s2090_s3 }
0x15ae   :  { %v1024_v47 = vpop.permute.xlu1 %1023 }
0x15af   :  { %v1026_v48 = vadd.f32 %v1024_v47, %v1016_v45 }
0x15b1   :  { %1996 = vtanh.f32 %v1026_v48 }
0x15b2   :  { %1998 = vrcp.f32 %v802_v46 }
0x15b3   :  { %2000 = vtanh.f32 %v797_v27 }
0x15bb   :  { %v1997_v49 = vpop.eup %1996 }
0x15bc   :  { %v1999_v51 = vpop.eup %1998  ;;  %1029 = vrot.lane.b32.xlu0 %v1997_v49, %s2085_s20 }
0x15bd   :  { %v2001_v52 = vpop.eup %2000 }
0x15be   :  { %v805_v53 = vsel %vm2206_vm4, %v2001_v52, %v1999_v51 }
0x15bf   :  { %v806_v2 = vmul.f32 %v805_v53, %v2342_v58 }
0x15c0   :  { %808 = vrot.lane.b32.xlu0 %v805_v53, %s2085_s20 }
0x162e   :  { %v1030_v54 = vpop.permute.xlu0 %1029 }
0x162f   :  { %v2418_v55 = vmul.f32 %v1030_v54, %v1015_v41 }
0x1631   :  { %v1059_v61 = vpack.c.bf16 %v2418_v55, %v2418_v55 }
0x1632   :  { %v809_v56 = vpop.permute.xlu0 %808 }
0x1633   :  { %v811_v57 = vmul.f32 %v809_v56, %v805_v53  ;;  %1061 = vrot.lane.b32.xlu1 %v1059_v61, %s2090_s3 }
0x1635   :  { %813 = vrot.lane.b32.xlu0 %v811_v57, %s2090_s3 }
0x16a5   :  { %v1062_v60 = vpop.permute.xlu1 %1061 }
0x16a6   :  { %1862 = vmatmul.mubr.msk.bf16.vlgmr.msra.gmra.mrb[24].mxu1 %vm200_vm5, %v1062_v60 }
0x16a7   :  { %v814_v4 = vpop.permute.xlu0 %813  ;;  %1874 = vmatpush3.bf16.msra.mxu1 %v2370_v18  ;;  %1877 = vmatprep.mubr.msk.bf16.mxu1 %vm2088_vm0, %v2087_v1 }
0x16a8   :  { %v816_v35 = vadd.f32 %v814_v4, %v806_v2  ;;  %1875 = vmatprep.subr.bf16.mxu1 %v2087_v1 }
0x16aa   :  { %2002 = vtanh.f32 %v816_v35 }
0x16ab   :  { %1876 = vmatpush3.bf16.msra.mxu1 %v2378_v20 }
0x16ac   :  { %1889 = vmatprep.subr.bf16.mxu1 %v2087_v1 }
0x16b4   :  { %v2003_v28 = vpop.eup %2002 }
0x16b5   :  { %819 = vrot.lane.b32.xlu0 %v2003_v28, %s2085_s20 }
0x16b9   :  { %587 = vrot.lane.b32.xlu0 %v2307_v19, %s2090_s3 }
0x16bd   :  { %745 = vrot.lane.b32.xlu0 %v2359_v10, %s2090_s3 }
0x1727   :  { %v820_v58 = vpop.permute.xlu0 %819 }
0x1728   :  { %v822_v30 = vmul.f32 %v820_v58, %v805_v53 }
0x172b   :  { %v588_v5 = vpop.permute.xlu0 %587 }
0x172c   :  { %590 = vst.msk [vmem:[#allocation3 + $0x20] sm:$0xff] %vm200_vm5, %v588_v5 }
0x172f   :  { %v746_v11 = vpop.permute.xlu0 %745 }
0x1730   :  { %748 = vst.msk [vmem:[#allocation3 + $0x30] sm:$0xff] %vm200_vm5, %v746_v11 }
0x1733   :  { %v832_v36 = vld [vmem:[#allocation3 + $0x20] sm:$0xff] }
0x1737   :  { %v834_v8 = vld [vmem:[#allocation3 + $0x30] sm:$0xff] }
0x1779   :  { %v1100_v62 = vpop.f32.mrb[24].mxu1 }
0x177a   :  { %v1106_v14 = vadd.f32 %v1100_v62, %v913_v13  ;;  %v1863_v15 = vpop.f32.mrb[25].mxu1  ;;  %v921_v13 = vadd.f32 %v2398_v23, %v2407_v31 }
0x177b   :  { %v1103_v59 = vpop.f32.mrb[26].mxu1 }
0x177c   :  { %v1691_v50 = vmul.f32 -1.442695, %v1106_v14  ;;  %v1864_v16 = vpop.f32.mrb[27].mxu1 }
0x177e   :  { %2004 = vpow2.f32 %v1691_v50 }
0x177f   :  { %2006 = vtanh.f32 %v1106_v14 }
0x1788   :  { %v2005_v19 = vpop.eup %2004 }
0x1789   :  { %v1111_v17 = vadd.f32 1.0, %v2005_v19  ;;  %v2007_v10 = vpop.eup %2006 }
0x178b   :  { %2008 = vrcp.f32 %v1111_v17 }
0x1795   :  { %v2009_v21 = vpop.eup %2008 }
0x1796   :  { %v1114_v22 = vsel %vm2206_vm4, %v2007_v10, %v2009_v21 }
0x1797   :  { %1117 = vrot.lane.b32.xlu1 %v1114_v22, %s2085_s20  ;;  %v1115_v26 = vmul.f32 %v1114_v22, %v1026_v48 }
0x1809   :  { %v1118_v7 = vpop.permute.xlu1 %1117 }
0x180a   :  { %v1120_v25 = vmul.f32 %v1118_v7, %v1114_v22 }
0x180c   :  { %1122 = vrot.lane.b32.xlu1 %v1120_v25, %s2090_s3 }
0x187e   :  { %v1123_v27 = vpop.permute.xlu1 %1122 }
0x187f   :  { %v1125_v29 = vadd.f32 %v1123_v27, %v1115_v26 }
0x1881   :  { %2010 = vtanh.f32 %v1125_v29 }
0x188b   :  { %v2011_v3 = vpop.eup %2010 }
0x188c   :  { %1128 = vrot.lane.b32.xlu1 %v2011_v3, %s2085_s20 }
0x1890   :  { %666 = vrot.lane.b32.xlu1 %v2326_v40, %s2090_s3 }
0x1894   :  { %824 = vrot.lane.b32.xlu1 %v822_v30, %s2090_s3 }
0x18fe   :  { %v1129_v32 = vpop.permute.xlu1 %1128 }
0x18ff   :  { %v2449_v6 = vmul.f32 %v1129_v32, %v1114_v22 }
0x1901   :  { %v1143_v33 = vpack.c.bf16 %v2449_v6, %v2449_v6 }
0x1902   :  { %v667_v0 = vpop.permute.xlu1 %666 }
0x1903   :  { %669 = vst.msk [vmem:[#allocation3 + $0x28] sm:$0xff] %vm200_vm5, %v667_v0  ;;  %1145 = vrot.lane.b32.xlu0 %v1143_v33, %s2090_s3 }
0x1906   :  { %v825_v34 = vpop.permute.xlu1 %824 }
0x1907   :  { %827 = vst.msk [vmem:[#allocation3 + $0x38] sm:$0xff] %vm200_vm5, %v825_v34 }
0x190a   :  { %v833_v37 = vld [vmem:[#allocation3 + $0x28] sm:$0xff] }
0x190b   :  { %v838_v40 = vpack.c.bf16 %v833_v37, %v832_v36 }
0x190d   :  { %1845 = vmatprep.mubr.msk.bf16.mxu0 %vm200_vm5, %v838_v40 }
0x190e   :  { %v835_v63 = vld [vmem:[#allocation3 + $0x38] sm:$0xff] }
0x190f   :  { %v839_v38 = vpack.c.bf16 %v835_v63, %v834_v8 }
0x1911   :  { %1846 = vmatmul.mubr.msk.bf16.gmra.mrb[24].mxu0 %vm200_vm5, %v839_v38 }
0x1912   :  { %1869 = vmatprep.mubr.msk.bf16.mxu0 %vm2088_vm0, %v2087_v1 }
0x1975   :  { %v1146_v39 = vpop.permute.xlu0 %1145 }
0x1976   :  { %1870 = vmatmul.mubr.msk.bf16.vlgmr.msra.gmra.mrb[28].mxu0 %vm200_vm5, %v1146_v39 }
0x1977   :  { %1882 = vmatpush3.bf16.msra.mxu0 %v2370_v18  ;;  %1885 = vmatprep.mubr.msk.bf16.mxu0 %vm2088_vm0, %v2087_v1 }
0x1978   :  { %1883 = vmatprep.subr.bf16.mxu0 %v2087_v1 }
0x197b   :  { %1884 = vmatpush3.bf16.msra.mxu0 %v2378_v20 }
0x197c   :  { %1897 = vmatprep.subr.bf16.mxu0 %v2087_v1 }
0x19e4   :  { %v2467_v41 = vpop.f32.mrb[24].mxu0 }
0x19e5   :  { %v2469_v42 = vpop.f32.mrb[25].mxu0 }
0x19e6   :  { %v2471_v43 = vpop.f32.mrb[26].mxu0  ;;  %v926_v0 = vadd.f32 %v2407_v31, %v2469_v42 }
0x19e7   :  { %v2473_v44 = vpop.f32.mrb[27].mxu0 }
0x1a49   :  { %v1184_v45 = vpop.f32.mrb[28].mxu0 }
0x1a4a   :  { %v1190_v46 = vadd.f32 %v1184_v45, %v918_v12  ;;  %v1871_v47 = vpop.f32.mrb[29].mxu0 }
0x1a4b   :  { %v1187_v48 = vpop.f32.mrb[30].mxu0 }
0x1a4c   :  { %v1693_v49 = vmul.f32 -1.442695, %v1190_v46  ;;  %v1872_v51 = vpop.f32.mrb[31].mxu0 }
0x1a4e   :  { %2012 = vpow2.f32 %v1693_v49 }
0x1a4f   :  { %2014 = vtanh.f32 %v1190_v46 }
0x1a58   :  { %v2013_v52 = vpop.eup %2012 }
0x1a59   :  { %v1195_v53 = vadd.f32 1.0, %v2013_v52  ;;  %v2015_v54 = vpop.eup %2014 }
0x1a5b   :  { %2016 = vrcp.f32 %v1195_v53 }
0x1a65   :  { %v2017_v61 = vpop.eup %2016 }
0x1a66   :  { %v1198_v56 = vsel %vm2206_vm4, %v2015_v54, %v2017_v61 }
0x1a67   :  { %1201 = vrot.lane.b32.xlu1 %v1198_v56, %s2085_s20  ;;  %v1199_v60 = vmul.f32 %v1198_v56, %v1125_v29 }
0x1ad9   :  { %v1202_v57 = vpop.permute.xlu1 %1201 }
0x1ada   :  { %v1204_v9 = vmul.f32 %v1202_v57, %v1198_v56  ;;  %v929_v57 = vadd.f32 %v2407_v31, %v2473_v44 }
0x1adc   :  { %1206 = vrot.lane.b32.xlu0 %v1204_v9, %s2090_s3 }
0x1b4e   :  { %v1207_v2 = vpop.permute.xlu0 %1206 }
0x1b4f   :  { %v1209_v4 = vadd.f32 %v1207_v2, %v1199_v60 }
0x1b51   :  { %2018 = vtanh.f32 %v1209_v4 }
0x1b5b   :  { %v2019_v35 = vpop.eup %2018 }
0x1b5c   :  { %1212 = vrot.lane.b32.xlu1 %v2019_v35, %s2085_s20 }
0x1bce   :  { %v1213_v28 = vpop.permute.xlu1 %1212 }
0x1bcf   :  { %v2482_v58 = vmul.f32 %v1213_v28, %v1198_v56 }
0x1bd1   :  { %v1227_v5 = vpack.c.bf16 %v2482_v58, %v2482_v58 }
0x1bd3   :  { %1229 = vrot.lane.b32.xlu0 %v1227_v5, %s2090_s3 }
0x1c45   :  { %v1230_v11 = vpop.permute.xlu0 %1229 }
0x1c46   :  { %1878 = vmatmul.mubr.msk.bf16.vlgmr.msra.gmra.mrb[28].mxu1 %vm200_vm5, %v1230_v11 }
0x1c47   :  { %1890 = vmatpush3.bf16.msra.mxu1 %v2370_v18  ;;  %1893 = vmatprep.mubr.msk.bf16.mxu1 %vm2088_vm0, %v2087_v1 }
0x1c48   :  { %1891 = vmatprep.subr.bf16.mxu1 %v2087_v1 }
0x1c4b   :  { %1892 = vmatpush3.bf16.msra.mxu1 %v2378_v20 }
0x1c4c   :  { %1905 = vmatprep.subr.bf16.mxu1 %v2087_v1 }
0x1d19   :  { %v1268_v62 = vpop.f32.mrb[28].mxu1 }
0x1d1a   :  { %v1274_v14 = vadd.f32 %v1268_v62, %v921_v13  ;;  %v1879_v15 = vpop.f32.mrb[29].mxu1 }
0x1d1b   :  { %v1271_v59 = vpop.f32.mrb[30].mxu1 }
0x1d1c   :  { %v1695_v50 = vmul.f32 -1.442695, %v1274_v14  ;;  %v1880_v16 = vpop.f32.mrb[31].mxu1 }
0x1d1e   :  { %2020 = vpow2.f32 %v1695_v50 }
0x1d1f   :  { %2022 = vtanh.f32 %v1274_v14 }
0x1d28   :  { %v2021_v19 = vpop.eup %2020 }
0x1d29   :  { %v1279_v17 = vadd.f32 1.0, %v2021_v19  ;;  %v2023_v10 = vpop.eup %2022 }
0x1d2b   :  { %2024 = vrcp.f32 %v1279_v17 }
0x1d35   :  { %v2025_v21 = vpop.eup %2024 }
0x1d36   :  { %v1282_v22 = vsel %vm2206_vm4, %v2023_v10, %v2025_v21  ;;  %v934_v10 = vadd.f32 %v2467_v41, %v2407_v31 }
0x1d37   :  { %1285 = vrot.lane.b32.xlu1 %v1282_v22, %s2085_s20  ;;  %v1283_v25 = vmul.f32 %v1282_v22, %v1209_v4 }
0x1da9   :  { %v1286_v7 = vpop.permute.xlu1 %1285 }
0x1daa   :  { %v1288_v23 = vmul.f32 %v1286_v7, %v1282_v22 }
0x1dac   :  { %1290 = vrot.lane.b32.xlu0 %v1288_v23, %s2090_s3 }
0x1e1e   :  { %v1291_v26 = vpop.permute.xlu0 %1290 }
0x1e1f   :  { %v1293_v27 = vadd.f32 %v1291_v26, %v1283_v25 }
0x1e21   :  { %2026 = vtanh.f32 %v1293_v27 }
0x1e2b   :  { %v2027_v29 = vpop.eup %2026 }
0x1e2c   :  { %1296 = vrot.lane.b32.xlu1 %v2027_v29, %s2085_s20 }
0x1e9e   :  { %v1297_v3 = vpop.permute.xlu1 %1296 }
0x1e9f   :  { %v2501_v30 = vmul.f32 %v1297_v3, %v1282_v22 }
0x1ea1   :  { %v1311_v32 = vpack.c.bf16 %v2501_v30, %v2501_v30 }
0x1ea3   :  { %1313 = vrot.lane.b32.xlu0 %v1311_v32, %s2090_s3 }
0x1f15   :  { %v1314_v33 = vpop.permute.xlu0 %1313 }
0x1f16   :  { %1886 = vmatmul.mubr.msk.bf16.vlgmr.msra.gmra.mrb[32].mxu0 %vm200_vm5, %v1314_v33 }
0x1f17   :  { %1898 = vmatpush3.bf16.msra.mxu0 %v2370_v18  ;;  %1901 = vmatprep.mubr.msk.bf16.mxu0 %vm2088_vm0, %v2087_v1 }
0x1f18   :  { %1899 = vmatprep.subr.bf16.mxu0 %v2087_v1 }
0x1f1b   :  { %1900 = vmatpush3.bf16.msra.mxu0 %v2378_v20 }
0x1fe9   :  { %v1352_v34 = vpop.f32.mrb[32].mxu0 }
0x1fea   :  { %v1358_v36 = vadd.f32 %v1352_v34, %v926_v0  ;;  %v1887_v37 = vpop.f32.mrb[33].mxu0 }
0x1feb   :  { %v1355_v40 = vpop.f32.mrb[34].mxu0 }
0x1fec   :  { %v1697_v8 = vmul.f32 -1.442695, %v1358_v36  ;;  %v1888_v63 = vpop.f32.mrb[35].mxu0 }
0x1fee   :  { %2028 = vpow2.f32 %v1697_v8 }
0x1fef   :  { %2030 = vtanh.f32 %v1358_v36 }
0x1ff8   :  { %v2029_v38 = vpop.eup %2028 }
0x1ff9   :  { %v1363_v39 = vadd.f32 1.0, %v2029_v38  ;;  %v2031_v12 = vpop.eup %2030 }
0x1ffb   :  { %2032 = vrcp.f32 %v1363_v39 }
0x2005   :  { %v2033_v45 = vpop.eup %2032 }
0x2006   :  { %v1366_v46 = vsel %vm2206_vm4, %v2031_v12, %v2033_v45  ;;  %v937_v12 = vadd.f32 %v2471_v43, %v2407_v31  ;;  %v1688_v31 = vld [vmem:[%s2623_s7] ss:$0 sm:$0xff] }
0x2007   :  { %1369 = vrot.lane.b32.xlu1 %v1366_v46, %s2085_s20  ;;  %v1367_v48 = vmul.f32 %v1366_v46, %v1293_v27 }
0x2079   :  { %v1370_v47 = vpop.permute.xlu1 %1369 }
0x207a   :  { %v1372_v42 = vmul.f32 %v1370_v47, %v1366_v46 }
0x207c   :  { %1374 = vrot.lane.b32.xlu0 %v1372_v42, %s2090_s3 }
0x20ee   :  { %v1375_v49 = vpop.permute.xlu0 %1374 }
0x20ef   :  { %v1377_v51 = vadd.f32 %v1375_v49, %v1367_v48 }
0x20f1   :  { %2034 = vtanh.f32 %v1377_v51 }
0x20fb   :  { %v2035_v52 = vpop.eup %2034 }
0x20fc   :  { %1380 = vrot.lane.b32.xlu1 %v2035_v52, %s2085_s20 }
0x216e   :  { %v1381_v53 = vpop.permute.xlu1 %1380 }
0x216f   :  { %v2519_v54 = vmul.f32 %v1381_v53, %v1366_v46 }
0x2171   :  { %v1395_v61 = vpack.c.bf16 %v2519_v54, %v2519_v54 }
0x2173   :  { %1397 = vrot.lane.b32.xlu0 %v1395_v61, %s2090_s3 }
0x21e5   :  { %v1398_v56 = vpop.permute.xlu0 %1397 }
0x21e6   :  { %1894 = vmatmul.mubr.msk.bf16.vlgmr.msra.gmra.mrb[32].mxu1 %vm200_vm5, %v1398_v56 }
0x21e7   :  { %1906 = vmatpush3.bf16.msra.mxu1 %v2370_v18  ;;  %1909 = vmatprep.mubr.msk.bf16.mxu1 %vm2088_vm0, %v2087_v1 }
0x21e8   :  { %1907 = vmatprep.subr.bf16.mxu1 %v2087_v1 }
0x21eb   :  { %1908 = vmatpush3.bf16.msra.mxu1 %v2378_v20 }
0x22b9   :  { %v1436_v9 = vpop.f32.mrb[32].mxu1 }
0x22ba   :  { %v1442_v60 = vadd.f32 %v1436_v9, %v929_v57  ;;  %v1895_v2 = vpop.f32.mrb[33].mxu1 }
0x22bb   :  { %v1439_v4 = vpop.f32.mrb[34].mxu1 }
0x22bc   :  { %v1699_v35 = vmul.f32 -1.442695, %v1442_v60  ;;  %v1896_v28 = vpop.f32.mrb[35].mxu1 }
0x22be   :  { %2036 = vpow2.f32 %v1699_v35 }
0x22bf   :  { %2038 = vtanh.f32 %v1442_v60 }
0x22c8   :  { %v2037_v5 = vpop.eup %2036 }
0x22c9   :  { %v1447_v11 = vadd.f32 1.0, %v2037_v5  ;;  %v2039_v18 = vpop.eup %2038 }
0x22cb   :  { %2040 = vrcp.f32 %v1447_v11 }
0x22d5   :  { %v2041_v13 = vpop.eup %2040 }
0x22d6   :  { %v1450_v1 = vsel %vm2206_vm4, %v2039_v18, %v2041_v13 }
0x22d7   :  { %1453 = vrot.lane.b32.xlu1 %v1450_v1, %s2085_s20  ;;  %v1451_v62 = vmul.f32 %v1450_v1, %v1377_v51 }
0x2349   :  { %v1454_v20 = vpop.permute.xlu1 %1453 }
0x234a   :  { %v1456_v44 = vmul.f32 %v1454_v20, %v1450_v1 }
0x234c   :  { %1458 = vrot.lane.b32.xlu0 %v1456_v44, %s2090_s3 }
0x23be   :  { %v1459_v14 = vpop.permute.xlu0 %1458 }
0x23bf   :  { %v1461_v15 = vadd.f32 %v1459_v14, %v1451_v62  ;;  %v1689_v14 = vld [vmem:[#allocation4] ss:$0 sm:$0xff] }
0x23c1   :  { %2042 = vtanh.f32 %v1461_v15 }
0x23cb   :  { %v2043_v59 = vpop.eup %2042 }
0x23cc   :  { %1464 = vrot.lane.b32.xlu1 %v2043_v59, %s2085_s20 }
0x243e   :  { %v1465_v50 = vpop.permute.xlu1 %1464 }
0x243f   :  { %v2537_v16 = vmul.f32 %v1465_v50, %v1450_v1 }
0x2441   :  { %v1479_v19 = vpack.c.bf16 %v2537_v16, %v2537_v16 }
0x2443   :  { %1481 = vrot.lane.b32.xlu0 %v1479_v19, %s2090_s3 }
0x24b5   :  { %v1482_v17 = vpop.permute.xlu0 %1481 }
0x24b6   :  { %1902 = vmatmul.mubr.msk.bf16.vlgmr.msra.gmra.mrb[36].mxu0 %vm200_vm5, %v1482_v17 }
0x2589   :  { %v1520_v21 = vpop.f32.mrb[36].mxu0 }
0x258a   :  { %v1526_v22 = vadd.f32 %v1520_v21, %v934_v10  ;;  %v1903_v7 = vpop.f32.mrb[37].mxu0 }
0x258b   :  { %v1523_v23 = vpop.f32.mrb[38].mxu0 }
0x258c   :  { %v1701_v25 = vmul.f32 -1.442695, %v1526_v22  ;;  %v1904_v26 = vpop.f32.mrb[39].mxu0 }
0x258e   :  { %2044 = vpow2.f32 %v1701_v25 }
0x258f   :  { %2046 = vtanh.f32 %v1526_v22 }
0x2598   :  { %v2045_v27 = vpop.eup %2044 }
0x2599   :  { %v1531_v29 = vadd.f32 1.0, %v2045_v27  ;;  %v2047_v3 = vpop.eup %2046 }
0x259b   :  { %2048 = vrcp.f32 %v1531_v29 }
0x25a5   :  { %v2049_v32 = vpop.eup %2048 }
0x25a6   :  { %v1534_v33 = vsel %vm2206_vm4, %v2047_v3, %v2049_v32 }
0x25a7   :  { %1537 = vrot.lane.b32.xlu1 %v1534_v33, %s2085_s20  ;;  %v1535_v34 = vmul.f32 %v1534_v33, %v1461_v15 }
0x2619   :  { %v1538_v0 = vpop.permute.xlu1 %1537 }
0x261a   :  { %v1540_v41 = vmul.f32 %v1538_v0, %v1534_v33 }
0x261c   :  { %1542 = vrot.lane.b32.xlu0 %v1540_v41, %s2090_s3 }
0x268e   :  { %v1543_v36 = vpop.permute.xlu0 %1542 }
0x268f   :  { %v1545_v37 = vadd.f32 %v1543_v36, %v1535_v34 }
0x2691   :  { %2050 = vtanh.f32 %v1545_v37 }
0x269b   :  { %v2051_v40 = vpop.eup %2050 }
0x269c   :  { %1548 = vrot.lane.b32.xlu1 %v2051_v40, %s2085_s20 }
0x270e   :  { %v1549_v8 = vpop.permute.xlu1 %1548 }
0x270f   :  { %v1551_v63 = vmul.f32 %v1549_v8, %v1534_v33 }
0x2711   :  { %v1563_v38 = vpack.c.bf16 %v1551_v63, %v1551_v63 }
0x2713   :  { %1565 = vrot.lane.b32.xlu0 %v1563_v38, %s2090_s3 }
0x2785   :  { %v1566_v39 = vpop.permute.xlu0 %1565 }
0x2786   :  { %1910 = vmatmul.mubr.msk.bf16.vlgmr.msra.gmra.mrb[36].mxu1 %vm200_vm5, %v1566_v39 }
0x2859   :  { %v1604_v45 = vpop.f32.mrb[36].mxu1 }
0x285a   :  { %v1610_v46 = vadd.f32 %v1604_v45, %v937_v12  ;;  %v1911_v47 = vpop.f32.mrb[37].mxu1 }
0x285b   :  { %v1607_v42 = vpop.f32.mrb[38].mxu1 }
0x285c   :  { %v1703_v48 = vmul.f32 -1.442695, %v1610_v46  ;;  %v1912_v49 = vpop.f32.mrb[39].mxu1 }
0x285e   :  { %2052 = vpow2.f32 %v1703_v48 }
0x285f   :  { %2054 = vtanh.f32 %v1610_v46 }
0x2868   :  { %v2053_v51 = vpop.eup %2052 }
0x2869   :  { %v1615_v52 = vadd.f32 1.0, %v2053_v51  ;;  %v2055_v53 = vpop.eup %2054 }
0x286b   :  { %2056 = vrcp.f32 %v1615_v52 }
0x2875   :  { %v2057_v61 = vpop.eup %2056 }
0x2876   :  { %v1618_v56 = vsel %vm2206_vm4, %v2055_v53, %v2057_v61 }
0x2877   :  { %1621 = vrot.lane.b32.xlu1 %v1618_v56, %s2085_s20  ;;  %v1619_v2 = vmul.f32 %v1618_v56, %v1545_v37 }
0x287b   :  { %1038 = vrot.lane.b32.xlu1 %v1688_v31, %s2091_s23 }
0x28e9   :  { %v1622_v43 = vpop.permute.xlu1 %1621 }
0x28ea   :  { %v1624_v57 = vmul.f32 %v1622_v43, %v1618_v56 }
0x28ec   :  { %1626 = vrot.lane.b32.xlu0 %v1624_v57, %s2090_s3 }
0x28ed   :  { %v1039_v9 = vpop.permute.xlu1 %1038 }
0x28ee   :  { %v1041_v60 = vmul.f32 %v1039_v9, %v2418_v55  ;;  %v1132_v11 = vmul.f32 %v2449_v6, %v1039_v9  ;;  %v1216_v18 = vmul.f32 %v2482_v58, %v1039_v9  ;;  %v1384_v55 = vmul.f32 %v2519_v54, %v1039_v9 }
0x28ef   :  { %v1468_v13 = vmul.f32 %v2537_v16, %v1039_v9  ;;  %v1552_v1 = vmul.f32 %v1551_v63, %v1039_v9  ;;  %v1300_v17 = vmul.f32 %v2501_v30, %v1039_v9 }
0x28f0   :  { %1043 = vrot.lane.b32.xlu0 %v1041_v60, %s2090_s3 }
0x295e   :  { %v1627_v24 = vpop.permute.xlu0 %1626 }
0x295f   :  { %v1629_v4 = vadd.f32 %v1627_v24, %v1619_v2 }
0x2961   :  { %2058 = vtanh.f32 %v1629_v4 }
0x2962   :  { %v1044_v35 = vpop.permute.xlu0 %1043 }
0x2963   :  { %v1046_v28 = vsel %vm200_vm5, %v1044_v35, 0.0 }
0x2964   :  { %1047 = vadd.xlane.f32.xlu1 %v1046_v28 }
0x296b   :  { %v2059_v5 = vpop.eup %2058 }
0x296c   :  { %1632 = vrot.lane.b32.xlu0 %v2059_v5, %s2085_s20 }
0x2970   :  { %1134 = vrot.lane.b32.xlu0 %v1132_v11, %s2090_s3 }
0x2975   :  { %1218 = vrot.lane.b32.xlu1 %v1216_v18, %s2090_s3 }
0x2979   :  { %1386 = vrot.lane.b32.xlu1 %v1384_v55, %s2090_s3 }
0x297d   :  { %1470 = vrot.lane.b32.xlu1 %v1468_v13, %s2090_s3 }
0x2981   :  { %1554 = vrot.lane.b32.xlu1 %v1552_v1, %s2090_s3 }
0x29de   :  { %v1633_v20 = vpop.permute.xlu0 %1632 }
0x29df   :  { %v1635_v44 = vmul.f32 %v1633_v20, %v1618_v56 }
0x29e1   :  { %v1636_v6 = vmul.f32 %v1635_v44, %v1039_v9 }
0x29e2   :  { %v1135_v62 = vpop.permute.xlu0 %1134 }
0x29e3   :  { %1638 = vrot.lane.b32.xlu1 %v1636_v6, %s2090_s3  ;;  %v1137_v58 = vsel %vm200_vm5, %v1135_v62, 0.0 }
0x29e4   :  { %1138 = vadd.xlane.f32.xlu0 %v1137_v58 }
0x29f1   :  { %v1048_v54 = vpop.xlane.xlu1 %1047 }
0x29f2   :  { %v1055_v15 = vadd.f32 %v1689_v14, %v1048_v54 }
0x29f4   :  { %1057 = vst.msk [vmem:[%s2625_s9] sm:$0xff] %vm1056_vm6, %v1055_v15 }
0x29f5   :  { %v1219_v59 = vpop.permute.xlu1 %1218 }
0x29f6   :  { %v1221_v50 = vsel %vm200_vm5, %v1219_v59, 0.0 }
0x29f7   :  { %1222 = vadd.xlane.f32.xlu0 %v1221_v50 }
0x29f9   :  { %v1387_v16 = vpop.permute.xlu1 %1386 }
0x29fa   :  { %v1389_v19 = vsel %vm200_vm5, %v1387_v16, 0.0 }
0x29fd   :  { %v1471_v10 = vpop.permute.xlu1 %1470 }
0x29fe   :  { %v1473_v3 = vsel %vm200_vm5, %v1471_v10, 0.0 }
0x2a01   :  { %v1555_v21 = vpop.permute.xlu1 %1554 }
0x2a02   :  { %v1557_v32 = vsel %vm200_vm5, %v1555_v21, 0.0 }
0x2a07   :  { %1390 = vadd.xlane.f32.xlu1 %v1389_v19 }
0x2a0d   :  { %1302 = vrot.lane.b32.xlu0 %v1300_v17, %s2090_s3 }
0x2a55   :  { %v1639_v22 = vpop.permute.xlu1 %1638 }
0x2a56   :  { %v1641_v7 = vsel %vm200_vm5, %v1639_v22, 0.0 }
0x2a57   :  { %1642 = vadd.xlane.f32.xlu1 %v1641_v7 }
0x2a71   :  { %v1139_v23 = vpop.xlane.xlu0 %1138 }
0x2a72   :  { %v1140_v25 = vadd.f32 %v1689_v14, %v1139_v23 }
0x2a74   :  { %1141 = vst.msk [vmem:[%s2625_s9 + $0x8] sm:$0xff] %vm1056_vm6, %v1140_v25 }
0x2a84   :  { %v1223_v26 = vpop.xlane.xlu0 %1222 }
0x2a85   :  { %v1224_v27 = vadd.f32 %v1689_v14, %v1223_v26 }
0x2a87   :  { %1225 = vst.msk [vmem:[%s2625_s9 + $0x10] sm:$0xff] %vm1056_vm6, %v1224_v27 }
0x2a88   :  { %v1303_v30 = vpop.permute.xlu0 %1302 }
0x2a89   :  { %v1305_v29 = vsel %vm200_vm5, %v1303_v30, 0.0 }
0x2a8a   :  { %1306 = vadd.xlane.f32.xlu0 %v1305_v29 }
0x2a8e   :  { %1474 = vadd.xlane.f32.xlu0 %v1473_v3 }
0x2a92   :  { %1558 = vadd.xlane.f32.xlu0 %v1557_v32 }
0x2a94   :  { %v1391_v33 = vpop.xlane.xlu1 %1390 }
0x2a95   :  { %v1392_v0 = vadd.f32 %v1689_v14, %v1391_v33 }
0x2a97   :  { %1393 = vst.msk [vmem:[%s2625_s9 + $0x20] sm:$0xff] %vm1056_vm6, %v1392_v0 }
0x2ae4   :  { %v1643_v41 = vpop.xlane.xlu1 %1642 }
0x2ae5   :  { %v1644_v34 = vadd.f32 %v1689_v14, %v1643_v41 }
0x2ae7   :  { %1645 = vst.msk [vmem:[%s2625_s9 + $0x38] sm:$0xff] %vm1056_vm6, %v1644_v34 }
0x2b17   :  { %v1307_v36 = vpop.xlane.xlu0 %1306 }
0x2b18   :  { %v1308_v37 = vadd.f32 %v1689_v14, %v1307_v36 }
0x2b1a   :  { %1309 = vst.msk [vmem:[%s2625_s9 + $0x18] sm:$0xff] %vm1056_vm6, %v1308_v37 }
0x2b1b   :  { %v1475_v40 = vpop.xlane.xlu0 %1474 }
0x2b1c   :  { %v1476_v8 = vadd.f32 %v1689_v14, %v1475_v40 }
0x2b1e   :  { %1477 = vst.msk [vmem:[%s2625_s9 + $0x28] sm:$0xff] %vm1056_vm6, %v1476_v8 }
0x2b1f   :  { %v1559_v63 = vpop.xlane.xlu0 %1558 }
0x2b20   :  { %v1560_v38 = vadd.f32 %v1689_v14, %v1559_v63 }
0x2b22   :  { %1561 = vst.msk [vmem:[%s2625_s9 + $0x30] sm:$0xff] %vm1056_vm6, %v1560_v38 }
0x2b23   :  { %1650 = vsyncpa [#allocation6], 1 }

</bundles_post_ra>
